<compile_context>
chip_gen: v5e
topology: v5e:2x2
jax: 0.10.0
libtpu: 0.0.40
codegen_flags: <defaults>
</compile_context>

<pallas_src>
import math
from functools import partial

import jax
import jax.numpy as jnp
import numpy as np
from jax.experimental import pallas as pl
from jax.experimental.pallas import tpu as pltpu

# ---- model hyper-parameters (defaults of AdvancedNCF) ----
MF_DIM = 64
MLP_DIM = 64
TEMPORAL_DIM = 32
MLP_HIDDEN = (256, 128, 64)
NUM_HEADS = 4
HEAD_DIM = MLP_DIM // NUM_HEADS
LN_EPS = 1e-5  # torch.nn.LayerNorm default


def _layer_norm_1pass(x, g, b):
    """One-pass LayerNorm: sum and sum-of-squares reduced independently."""
    inv_n = 1.0 / x.shape[-1]
    s1 = jnp.sum(x, axis=-1, keepdims=True)
    s2 = jnp.sum(x * x, axis=-1, keepdims=True)
    mu = s1 * inv_n
    var = s2 * inv_n - mu * mu
    inv = jax.lax.rsqrt(var + LN_EPS)
    return (x - mu) * inv * g + b


def _ncf_kernel(
    umf_ref, pmf_ref, umlp_ref, pmlp_ref, bias_ref,
    mfg_ref, mfb_ref, mlpg_ref, mlpb_ref,
    wqh_ref, bqh_ref, wkh_ref, bkh_ref, wvh_ref, bvh_ref, woh_ref, bo_ref,
    w1_ref, b1_ref, g1_ref, be1_ref,
    w2_ref, b2_ref, g2_ref, be2_ref,
    w3_ref, b3_ref, g3_ref, be3_ref,
    wmfr_ref, wmlpr_ref, bfin_ref,
    out_ref,
    *, rows,
):
    f32 = jnp.float32
    R = rows

    # ---------------- MF + MLP input LayerNorms (shared gamma/beta) -------
    # Stack [user; product] rows so each shared LN runs once (one-pass form).
    mf = _layer_norm_1pass(
        jnp.concatenate([umf_ref[...], pmf_ref[...]], axis=0),
        mfg_ref[...], mfb_ref[...])                                   # (2R, 64)
    u_mf, p_mf = mf[:R], mf[R:]
    mf_vec = u_mf * p_mf                                              # (R, 64)

    ml = _layer_norm_1pass(
        jnp.concatenate([umlp_ref[...], pmlp_ref[...]], axis=0),
        mlpg_ref[...], mlpb_ref[...])                                 # (2R, 64)
    u_mlp, p_mlp = ml[:R], ml[R:]

    # ------- multi-head user/product attention (block-diag over the tile) --
    inv_scale = 1.0 / math.sqrt(HEAD_DIM)
    neg_bias = bias_ref[...]                                          # (R, R)
    attn = None
    for h in range(NUM_HEADS):  # per-head weights pre-split at trace time
        qh = jnp.dot(u_mlp, wqh_ref[h], preferred_element_type=f32) + bqh_ref[h]
        kh = jnp.dot(p_mlp, wkh_ref[h], preferred_element_type=f32) + bkh_ref[h]
        vh = jnp.dot(p_mlp, wvh_ref[h], preferred_element_type=f32) + bvh_ref[h]
        # scores = qh @ kh^T, masked to each interaction's SxS diagonal block
        s = jax.lax.dot_general(qh, kh, (((1,), (1,)), ((), ())),
                                preferred_element_type=f32) * inv_scale
        s = s + neg_bias
        s = s - jnp.max(s, axis=-1, keepdims=True)
        e = jnp.exp(s)
        p_attn = e * pl.reciprocal(jnp.sum(e, axis=-1, keepdims=True),
                                   approx=True)
        ho = jnp.dot(p_attn, vh, preferred_element_type=f32)          # (R, 16)
        # fold the output projection per head (avoids 4-way lane concat)
        contrib = jnp.dot(ho, woh_ref[h], preferred_element_type=f32)  # (R, 64)
        attn = contrib if attn is None else attn + contrib
    attn = attn + bo_ref[...]
    # TODO(synk): nn.Dropout layers are treated as identity (eval-mode semantics).

    # ------- MLP tower: [Linear, ReLU, LayerNorm, Dropout] x 3 -------------
    # temporal_embeds is an explicit zeros() tensor in AdvancedNCF.forward();
    # w1 was sliced to its first 64 rows in the wrapper, so no concat needed.
    h1 = jnp.maximum(jnp.dot(attn, w1_ref[...], preferred_element_type=f32)
                     + b1_ref[...], 0.0)
    h1 = _layer_norm_1pass(h1, g1_ref[...], be1_ref[...])             # (R, 256)
    h2 = jnp.maximum(jnp.dot(h1, w2_ref[...], preferred_element_type=f32)
                     + b2_ref[...], 0.0)
    h2 = _layer_norm_1pass(h2, g2_ref[...], be2_ref[...])             # (R, 128)
    h3 = jnp.maximum(jnp.dot(h2, w3_ref[...], preferred_element_type=f32)
                     + b3_ref[...], 0.0)
    h3 = _layer_norm_1pass(h3, g3_ref[...], be3_ref[...])             # (R, 64)

    # ------- fused MF head + MLP head + final Linear(2,1), lane-dense ------
    # logit (1, R) = wmf' @ mf_vec^T + wmlp' @ h3^T + fused_bias
    logit = jax.lax.dot_general(wmfr_ref[...], mf_vec,
                                (((1,), (1,)), ((), ())),
                                preferred_element_type=f32)
    logit = logit + jax.lax.dot_general(wmlpr_ref[...], h3,
                                        (((1,), (1,)), ((), ())),
                                        preferred_element_type=f32)
    logit = logit + bfin_ref[...]
    out_ref[...] = jax.nn.sigmoid(logit).reshape(1, 1, R)


def _pick_b_tile(batch_size, seq, target_rows=128):
    """Largest B_TILE dividing batch_size with B_TILE*seq <= target rows
    (rows must be a multiple of 8 unless the tile covers the whole batch)."""
    candidates = [bt for bt in range(1, batch_size + 1)
                  if batch_size % bt == 0
                  and ((bt * seq) % 8 == 0 or bt == batch_size)]
    small = [bt for bt in candidates if bt * seq <= target_rows]
    return max(small) if small else min(candidates)


def advanced_ncf_forward(params, user_ids, product_ids, batch_size,
                         samples_per_interaction, target_rows=128):
    """Full-model forward. user_ids/product_ids: int32 (total,)"""
    total = user_ids.shape[0]
    S = samples_per_interaction
    assert total == batch_size * S

    # EmbeddingBag (SUM pooling over length-1 bags) == plain row gather (glue)
    # TODO(synk): gather could be fused in-kernel via scalar-prefetched ids +
    # per-row DMA from tables kept in pl.ANY; left as XLA glue here.
    umf = params["mf_user"][user_ids]
    pmf = params["mf_prod"][product_ids]
    umlp = params["mlp_user"][user_ids]
    pmlp = params["mlp_prod"][product_ids]

    B_TILE = _pick_b_tile(batch_size, S, target_rows)
    R = B_TILE * S
    num_tiles = batch_size // B_TILE

    # block-diagonal additive attention mask (each interaction attends only
    # within its own S rows) — built once on host, passed as a resident input
    blk = np.repeat(np.arange(B_TILE), S)
    attn_bias = jnp.asarray(
        np.where(blk[:, None] == blk[None, :], 0.0, -1e30).astype(np.float32))

    # ---- trace-time weight preprocessing ----
    H, D = NUM_HEADS, HEAD_DIM
    split_w = lambda w: jnp.transpose(w.reshape(MLP_DIM, H, D), (1, 0, 2))
    split_b = lambda b: jnp.transpose(b.reshape(1, H, D), (1, 0, 2))
    wqh, bqh = split_w(params["wq"]), split_b(params["bq"])
    wkh, bkh = split_w(params["wk"]), split_b(params["bk"])
    wvh, bvh = split_w(params["wv"]), split_b(params["bv"])
    woh = params["wo"].reshape(H, D, MLP_DIM)
    w1s = params["w1"][:MLP_DIM]                      # drop temporal-zero rows
    wf = params["wf"]
    wmf_row = (params["wmf"] * wf[0, 0]).T            # (1, 64)
    wmlp_row = (params["wmlp"] * wf[0, 1]).T          # (1, 64)
    bfin = params["bmf"] * wf[0, 0] + params["bmlp"] * wf[0, 1] + params["bf"]

    weights = [
        params["mf_norm_g"], params["mf_norm_b"],
        params["mlp_norm_g"], params["mlp_norm_b"],
        wqh, bqh, wkh, bkh, wvh, bvh, woh, params["bo"],
        w1s, params["b1"], params["ln1_g"], params["ln1_b"],
        params["w2"], params["b2"], params["ln2_g"], params["ln2_b"],
        params["w3"], params["b3"], params["ln3_g"], params["ln3_b"],
        wmf_row, wmlp_row, bfin,
    ]

    def row_spec(feat_dim):
        return pl.BlockSpec((R, feat_dim), lambda i: (i, 0))

    def full_spec(a):
        return pl.BlockSpec(a.shape, lambda i, _nd=a.ndim: (0,) * _nd)

    in_specs = ([row_spec(MF_DIM), row_spec(MF_DIM),
                 row_spec(MLP_DIM), row_spec(MLP_DIM),
                 full_spec(attn_bias)] +
                [full_spec(w) for w in weights])
    out_spec = pl.BlockSpec((1, 1, R), lambda i: (i, 0, 0))

    kernel = partial(_ncf_kernel, rows=R)
    out = pl.pallas_call(
        kernel,
        out_shape=jax.ShapeDtypeStruct((num_tiles, 1, R), jnp.float32),
        grid_spec=pltpu.PrefetchScalarGridSpec(
            num_scalar_prefetch=0,
            grid=(num_tiles,),
            in_specs=in_specs,
            out_specs=out_spec,
        ),
        compiler_params=pltpu.CompilerParams(
            dimension_semantics=("parallel",)),
    )(umf, pmf, umlp, pmlp, attn_bias, *weights)
    return out.reshape(total, 1)


# ------------------- deterministic parameter init -------------------
def init_params(key, num_users, num_products):
    ks = iter(jax.random.split(key, 40))
    n = lambda shape, s=0.05: jax.random.normal(next(ks), shape, jnp.float32) * s
    p = {}
    p["mf_user"] = n((num_users, MF_DIM), 0.1)
    p["mf_prod"] = n((num_products, MF_DIM), 0.1)
    p["mlp_user"] = n((num_users, MLP_DIM), 0.1)
    p["mlp_prod"] = n((num_products, MLP_DIM), 0.1)
    p["mf_norm_g"] = jnp.ones((1, MF_DIM), jnp.float32)
    p["mf_norm_b"] = jnp.zeros((1, MF_DIM), jnp.float32)
    p["mlp_norm_g"] = jnp.ones((1, MLP_DIM), jnp.float32)
    p["mlp_norm_b"] = jnp.zeros((1, MLP_DIM), jnp.float32)
    for nm in ("q", "k", "v", "o"):
        p[f"w{nm}"] = n((MLP_DIM, MLP_DIM))
        p[f"b{nm}"] = n((1, MLP_DIM), 0.01)
    dims = [MLP_DIM + TEMPORAL_DIM] + list(MLP_HIDDEN)
    for li in range(3):
        p[f"w{li+1}"] = n((dims[li], dims[li + 1]))
        p[f"b{li+1}"] = n((1, dims[li + 1]), 0.01)
        p[f"ln{li+1}_g"] = jnp.ones((1, dims[li + 1]), jnp.float32)
        p[f"ln{li+1}_b"] = jnp.zeros((1, dims[li + 1]), jnp.float32)
    p["wmf"] = n((MF_DIM, 1))
    p["bmf"] = n((1, 1), 0.01)
    p["wmlp"] = n((MLP_HIDDEN[-1], 1))
    p["bmlp"] = n((1, 1), 0.01)
    p["wf"] = n((1, 2), 0.5)
    p["bf"] = n((1, 1), 0.01)
    return p


# ------------------- pure-JAX reference (for verification) -------------------
def reference_forward(p, user_ids, product_ids, batch_size, S):
    hp = jax.lax.Precision.HIGHEST
    dot = lambda a, b: jnp.dot(a, b, precision=hp)
    ln = lambda x, g, b: ((x - x.mean(-1, keepdims=True))
                          * jax.lax.rsqrt(x.var(-1, keepdims=True) + LN_EPS)
                          * g + b)
    total = user_ids.shape[0]

    u_mf = ln(p["mf_user"][user_ids], p["mf_norm_g"], p["mf_norm_b"])
    p_mf = ln(p["mf_prod"][product_ids], p["mf_norm_g"], p["mf_norm_b"])
    mf_pred = dot(u_mf * p_mf, p["wmf"]) + p["bmf"]

    u_mlp = ln(p["mlp_user"][user_ids], p["mlp_norm_g"], p["mlp_norm_b"])
    p_mlp = ln(p["mlp_prod"][product_ids], p["mlp_norm_g"], p["mlp_norm_b"])

    q = (dot(u_mlp, p["wq"]) + p["bq"]).reshape(batch_size, S, NUM_HEADS, HEAD_DIM)
    k = (dot(p_mlp, p["wk"]) + p["bk"]).reshape(batch_size, S, NUM_HEADS, HEAD_DIM)
    v = (dot(p_mlp, p["wv"]) + p["bv"]).reshape(batch_size, S, NUM_HEADS, HEAD_DIM)
    q, k, v = (t.transpose(0, 2, 1, 3) for t in (q, k, v))
    scores = jnp.einsum("bhqd,bhkd->bhqk", q, k, precision=hp) / math.sqrt(HEAD_DIM)
    w = jax.nn.softmax(scores, axis=-1)
    o = jnp.einsum("bhqk,bhkd->bhqd", w, v, precision=hp)
    o = o.transpose(0, 2, 1, 3).reshape(total, MLP_DIM)
    attn = dot(o, p["wo"]) + p["bo"]

    comb = jnp.concatenate(
        [attn, jnp.zeros((total, TEMPORAL_DIM), jnp.float32)], axis=-1)
    h = comb
    for li in range(3):
        h = jnp.maximum(dot(h, p[f"w{li+1}"]) + p[f"b{li+1}"], 0.0)
        h = ln(h, p[f"ln{li+1}_g"], p[f"ln{li+1}_b"])
    mlp_pred = dot(h, p["wmlp"]) + p["bmlp"]

    logit = mf_pred * p["wf"][0, 0] + mlp_pred * p["wf"][0, 1] + p["bf"]
    return jax.nn.sigmoid(logit)


if __name__ == "__main__":
    num_users, num_products = 100, 200
    key = jax.random.PRNGKey(0)
    pkey, ukey, ikey = jax.random.split(key, 3)
    params = init_params(pkey, num_users, num_products)

    # case 1: tiny shapes (single tile)
    batch_size = 2
    negative_samples = 7            # seq = 1 + negatives = 8 (sublane aligned)
    S = 1 + negative_samples
    total = batch_size * S
    user_ids = jax.random.randint(ukey, (total,), 0, num_users, dtype=jnp.int32)
    product_ids = jax.random.randint(ikey, (total,), 0, num_products, dtype=jnp.int32)

    out = advanced_ncf_forward(params, user_ids, product_ids, batch_size, S)
    out = jax.block_until_ready(out)
    assert out.shape == (total, 1)
    ref = reference_forward(params, user_ids, product_ids, batch_size, S)
    np.testing.assert_allclose(np.asarray(out), np.asarray(ref),
                               rtol=1e-2, atol=5e-3)

    # case 2: multi-tile grid path (128 rows / grid step, 2 steps)
    batch_size2 = 32
    total2 = batch_size2 * S
    u2 = jax.random.randint(jax.random.PRNGKey(3), (total2,), 0, num_users,
                            dtype=jnp.int32)
    p2 = jax.random.randint(jax.random.PRNGKey(4), (total2,), 0, num_products,
                            dtype=jnp.int32)
    out2 = advanced_ncf_forward(params, u2, p2, batch_size2, S)
    out2 = jax.block_until_ready(out2)
    assert out2.shape == (total2, 1)
    ref2 = reference_forward(params, u2, p2, batch_size2, S)
    np.testing.assert_allclose(np.asarray(out2), np.asarray(ref2),
                               rtol=1e-2, atol=5e-3)

    print("KERNEL_OK")
</pallas_src>

<mosaic_0001>
module attributes {stable_mosaic.version = 11 : i64} {
  func.func @_ncf_kernel(%arg0: i32, %arg1: memref<16x64xf32, #tpu.memory_space<vmem>>, %arg2: memref<16x64xf32, #tpu.memory_space<vmem>>, %arg3: memref<16x64xf32, #tpu.memory_space<vmem>>, %arg4: memref<16x64xf32, #tpu.memory_space<vmem>>, %arg5: memref<16x16xf32, #tpu.memory_space<vmem>>, %arg6: memref<1x64xf32, #tpu.memory_space<vmem>>, %arg7: memref<1x64xf32, #tpu.memory_space<vmem>>, %arg8: memref<1x64xf32, #tpu.memory_space<vmem>>, %arg9: memref<1x64xf32, #tpu.memory_space<vmem>>, %arg10: memref<4x64x16xf32, #tpu.memory_space<vmem>>, %arg11: memref<4x1x16xf32, #tpu.memory_space<vmem>>, %arg12: memref<4x64x16xf32, #tpu.memory_space<vmem>>, %arg13: memref<4x1x16xf32, #tpu.memory_space<vmem>>, %arg14: memref<4x64x16xf32, #tpu.memory_space<vmem>>, %arg15: memref<4x1x16xf32, #tpu.memory_space<vmem>>, %arg16: memref<4x16x64xf32, #tpu.memory_space<vmem>>, %arg17: memref<1x64xf32, #tpu.memory_space<vmem>>, %arg18: memref<64x256xf32, #tpu.memory_space<vmem>>, %arg19: memref<1x256xf32, #tpu.memory_space<vmem>>, %arg20: memref<1x256xf32, #tpu.memory_space<vmem>>, %arg21: memref<1x256xf32, #tpu.memory_space<vmem>>, %arg22: memref<256x128xf32, #tpu.memory_space<vmem>>, %arg23: memref<1x128xf32, #tpu.memory_space<vmem>>, %arg24: memref<1x128xf32, #tpu.memory_space<vmem>>, %arg25: memref<1x128xf32, #tpu.memory_space<vmem>>, %arg26: memref<128x64xf32, #tpu.memory_space<vmem>>, %arg27: memref<1x64xf32, #tpu.memory_space<vmem>>, %arg28: memref<1x64xf32, #tpu.memory_space<vmem>>, %arg29: memref<1x64xf32, #tpu.memory_space<vmem>>, %arg30: memref<1x64xf32, #tpu.memory_space<vmem>>, %arg31: memref<1x64xf32, #tpu.memory_space<vmem>>, %arg32: memref<1x1xf32, #tpu.memory_space<vmem>>, %arg33: memref<1x1x16xf32, #tpu.memory_space<vmem>>) attributes {dimension_semantics = [#tpu.dimension_semantics<parallel>], iteration_bounds = array<i64: 1>, scalar_prefetch = 0 : i64, scratch_operands = 0 : i64, tpu.core_type = #tpu.core_type<tc>, window_params = [{transform_indices = @transform_0, window_bounds = array<i64: 16, 64>}, {transform_indices = @transform_1, window_bounds = array<i64: 16, 64>}, {transform_indices = @transform_2, window_bounds = array<i64: 16, 64>}, {transform_indices = @transform_3, window_bounds = array<i64: 16, 64>}, {pipeline_mode = #tpu.pipeline_mode<synchronous>, transform_indices = @transform_4, window_bounds = array<i64: 16, 16>}, {pipeline_mode = #tpu.pipeline_mode<synchronous>, transform_indices = @transform_5, window_bounds = array<i64: 1, 64>}, {pipeline_mode = #tpu.pipeline_mode<synchronous>, transform_indices = @transform_6, window_bounds = array<i64: 1, 64>}, {pipeline_mode = #tpu.pipeline_mode<synchronous>, transform_indices = @transform_7, window_bounds = array<i64: 1, 64>}, {pipeline_mode = #tpu.pipeline_mode<synchronous>, transform_indices = @transform_8, window_bounds = array<i64: 1, 64>}, {pipeline_mode = #tpu.pipeline_mode<synchronous>, transform_indices = @transform_9, window_bounds = array<i64: 4, 64, 16>}, {pipeline_mode = #tpu.pipeline_mode<synchronous>, transform_indices = @transform_10, window_bounds = array<i64: 4, 1, 16>}, {pipeline_mode = #tpu.pipeline_mode<synchronous>, transform_indices = @transform_11, window_bounds = array<i64: 4, 64, 16>}, {pipeline_mode = #tpu.pipeline_mode<synchronous>, transform_indices = @transform_12, window_bounds = array<i64: 4, 1, 16>}, {pipeline_mode = #tpu.pipeline_mode<synchronous>, transform_indices = @transform_13, window_bounds = array<i64: 4, 64, 16>}, {pipeline_mode = #tpu.pipeline_mode<synchronous>, transform_indices = @transform_14, window_bounds = array<i64: 4, 1, 16>}, {pipeline_mode = #tpu.pipeline_mode<synchronous>, transform_indices = @transform_15, window_bounds = array<i64: 4, 16, 64>}, {pipeline_mode = #tpu.pipeline_mode<synchronous>, transform_indices = @transform_16, window_bounds = array<i64: 1, 64>}, {pipeline_mode = #tpu.pipeline_mode<synchronous>, transform_indices = @transform_17, window_bounds = array<i64: 64, 256>}, {pipeline_mode = #tpu.pipeline_mode<synchronous>, transform_indices = @transform_18, window_bounds = array<i64: 1, 256>}, {pipeline_mode = #tpu.pipeline_mode<synchronous>, transform_indices = @transform_19, window_bounds = array<i64: 1, 256>}, {pipeline_mode = #tpu.pipeline_mode<synchronous>, transform_indices = @transform_20, window_bounds = array<i64: 1, 256>}, {pipeline_mode = #tpu.pipeline_mode<synchronous>, transform_indices = @transform_21, window_bounds = array<i64: 256, 128>}, {pipeline_mode = #tpu.pipeline_mode<synchronous>, transform_indices = @transform_22, window_bounds = array<i64: 1, 128>}, {pipeline_mode = #tpu.pipeline_mode<synchronous>, transform_indices = @transform_23, window_bounds = array<i64: 1, 128>}, {pipeline_mode = #tpu.pipeline_mode<synchronous>, transform_indices = @transform_24, window_bounds = array<i64: 1, 128>}, {pipeline_mode = #tpu.pipeline_mode<synchronous>, transform_indices = @transform_25, window_bounds = array<i64: 128, 64>}, {pipeline_mode = #tpu.pipeline_mode<synchronous>, transform_indices = @transform_26, window_bounds = array<i64: 1, 64>}, {pipeline_mode = #tpu.pipeline_mode<synchronous>, transform_indices = @transform_27, window_bounds = array<i64: 1, 64>}, {pipeline_mode = #tpu.pipeline_mode<synchronous>, transform_indices = @transform_28, window_bounds = array<i64: 1, 64>}, {pipeline_mode = #tpu.pipeline_mode<synchronous>, transform_indices = @transform_29, window_bounds = array<i64: 1, 64>}, {pipeline_mode = #tpu.pipeline_mode<synchronous>, transform_indices = @transform_30, window_bounds = array<i64: 1, 64>}, {pipeline_mode = #tpu.pipeline_mode<synchronous>, transform_indices = @transform_31, window_bounds = array<i64: 1, 1>}, {transform_indices = @transform_32, window_bounds = array<i64: 1, 1, 16>}]} {
    %c0 = arith.constant 0 : index
    %c0_0 = arith.constant 0 : index
    %0 = vector.load %arg1[%c0, %c0_0] : memref<16x64xf32, #tpu.memory_space<vmem>>, vector<16x64xf32>
    %c0_1 = arith.constant 0 : index
    %c0_2 = arith.constant 0 : index
    %1 = vector.load %arg2[%c0_1, %c0_2] : memref<16x64xf32, #tpu.memory_space<vmem>>, vector<16x64xf32>
    %2 = tpu.concatenate %0, %1 in 0 : vector<16x64xf32>, vector<16x64xf32> -> vector<32x64xf32>
    %c0_3 = arith.constant 0 : index
    %c0_4 = arith.constant 0 : index
    %3 = vector.load %arg6[%c0_3, %c0_4] : memref<1x64xf32, #tpu.memory_space<vmem>>, vector<1x64xf32>
    %c0_5 = arith.constant 0 : index
    %c0_6 = arith.constant 0 : index
    %4 = vector.load %arg7[%c0_5, %c0_6] : memref<1x64xf32, #tpu.memory_space<vmem>>, vector<1x64xf32>
    %cst = arith.constant dense<0.000000e+00> : vector<32xf32>
    %5 = vector.multi_reduction <add>, %2, %cst [1] : vector<32x64xf32> to vector<32xf32>
    %6 = vector.shape_cast %5 : vector<32xf32> to vector<32x1xf32>
    %7 = arith.mulf %2, %2 : vector<32x64xf32>
    %cst_7 = arith.constant dense<0.000000e+00> : vector<32xf32>
    %8 = vector.multi_reduction <add>, %7, %cst_7 [1] : vector<32x64xf32> to vector<32xf32>
    %9 = vector.shape_cast %8 : vector<32xf32> to vector<32x1xf32>
    %cst_8 = arith.constant 1.562500e-02 : f32
    %10 = vector.broadcast %cst_8 : f32 to vector<32x1xf32>
    %11 = arith.mulf %6, %10 : vector<32x1xf32>
    %cst_9 = arith.constant 1.562500e-02 : f32
    %12 = vector.broadcast %cst_9 : f32 to vector<32x1xf32>
    %13 = arith.mulf %9, %12 : vector<32x1xf32>
    %14 = arith.mulf %11, %11 : vector<32x1xf32>
    %15 = arith.subf %13, %14 : vector<32x1xf32>
    %cst_10 = arith.constant 9.99999974E-6 : f32
    %16 = vector.broadcast %cst_10 : f32 to vector<32x1xf32>
    %17 = arith.addf %15, %16 : vector<32x1xf32>
    %18 = math.rsqrt %17 : vector<32x1xf32>
    %19 = vector.broadcast %11 : vector<32x1xf32> to vector<32x64xf32>
    %20 = arith.subf %2, %19 : vector<32x64xf32>
    %21 = vector.broadcast %18 : vector<32x1xf32> to vector<32x64xf32>
    %22 = arith.mulf %20, %21 : vector<32x64xf32>
    %23 = vector.broadcast %3 : vector<1x64xf32> to vector<32x64xf32>
    %24 = arith.mulf %22, %23 : vector<32x64xf32>
    %25 = vector.broadcast %4 : vector<1x64xf32> to vector<32x64xf32>
    %26 = arith.addf %24, %25 : vector<32x64xf32>
    %27 = vector.extract_strided_slice %26 {offsets = [0, 0], sizes = [16, 64], strides = [1, 1]} : vector<32x64xf32> to vector<16x64xf32>
    %28 = vector.extract_strided_slice %26 {offsets = [16, 0], sizes = [16, 64], strides = [1, 1]} : vector<32x64xf32> to vector<16x64xf32>
    %29 = arith.mulf %27, %28 : vector<16x64xf32>
    %c0_11 = arith.constant 0 : index
    %c0_12 = arith.constant 0 : index
    %30 = vector.load %arg3[%c0_11, %c0_12] : memref<16x64xf32, #tpu.memory_space<vmem>>, vector<16x64xf32>
    %c0_13 = arith.constant 0 : index
    %c0_14 = arith.constant 0 : index
    %31 = vector.load %arg4[%c0_13, %c0_14] : memref<16x64xf32, #tpu.memory_space<vmem>>, vector<16x64xf32>
    %32 = tpu.concatenate %30, %31 in 0 : vector<16x64xf32>, vector<16x64xf32> -> vector<32x64xf32>
    %c0_15 = arith.constant 0 : index
    %c0_16 = arith.constant 0 : index
    %33 = vector.load %arg8[%c0_15, %c0_16] : memref<1x64xf32, #tpu.memory_space<vmem>>, vector<1x64xf32>
    %c0_17 = arith.constant 0 : index
    %c0_18 = arith.constant 0 : index
    %34 = vector.load %arg9[%c0_17, %c0_18] : memref<1x64xf32, #tpu.memory_space<vmem>>, vector<1x64xf32>
    %cst_19 = arith.constant dense<0.000000e+00> : vector<32xf32>
    %35 = vector.multi_reduction <add>, %32, %cst_19 [1] : vector<32x64xf32> to vector<32xf32>
    %36 = vector.shape_cast %35 : vector<32xf32> to vector<32x1xf32>
    %37 = arith.mulf %32, %32 : vector<32x64xf32>
    %cst_20 = arith.constant dense<0.000000e+00> : vector<32xf32>
    %38 = vector.multi_reduction <add>, %37, %cst_20 [1] : vector<32x64xf32> to vector<32xf32>
    %39 = vector.shape_cast %38 : vector<32xf32> to vector<32x1xf32>
    %cst_21 = arith.constant 1.562500e-02 : f32
    %40 = vector.broadcast %cst_21 : f32 to vector<32x1xf32>
    %41 = arith.mulf %36, %40 : vector<32x1xf32>
    %cst_22 = arith.constant 1.562500e-02 : f32
    %42 = vector.broadcast %cst_22 : f32 to vector<32x1xf32>
    %43 = arith.mulf %39, %42 : vector<32x1xf32>
    %44 = arith.mulf %41, %41 : vector<32x1xf32>
    %45 = arith.subf %43, %44 : vector<32x1xf32>
    %cst_23 = arith.constant 9.99999974E-6 : f32
    %46 = vector.broadcast %cst_23 : f32 to vector<32x1xf32>
    %47 = arith.addf %45, %46 : vector<32x1xf32>
    %48 = math.rsqrt %47 : vector<32x1xf32>
    %49 = vector.broadcast %41 : vector<32x1xf32> to vector<32x64xf32>
    %50 = arith.subf %32, %49 : vector<32x64xf32>
    %51 = vector.broadcast %48 : vector<32x1xf32> to vector<32x64xf32>
    %52 = arith.mulf %50, %51 : vector<32x64xf32>
    %53 = vector.broadcast %33 : vector<1x64xf32> to vector<32x64xf32>
    %54 = arith.mulf %52, %53 : vector<32x64xf32>
    %55 = vector.broadcast %34 : vector<1x64xf32> to vector<32x64xf32>
    %56 = arith.addf %54, %55 : vector<32x64xf32>
    %57 = vector.extract_strided_slice %56 {offsets = [0, 0], sizes = [16, 64], strides = [1, 1]} : vector<32x64xf32> to vector<16x64xf32>
    %58 = vector.extract_strided_slice %56 {offsets = [16, 0], sizes = [16, 64], strides = [1, 1]} : vector<32x64xf32> to vector<16x64xf32>
    %c0_24 = arith.constant 0 : index
    %c0_25 = arith.constant 0 : index
    %59 = vector.load %arg5[%c0_24, %c0_25] : memref<16x16xf32, #tpu.memory_space<vmem>>, vector<16x16xf32>
    %c0_26 = arith.constant 0 : index
    %c0_27 = arith.constant 0 : index
    %c0_28 = arith.constant 0 : index
    %60 = vector.load %arg10[%c0_26, %c0_27, %c0_28] : memref<4x64x16xf32, #tpu.memory_space<vmem>>, vector<1x64x16xf32>
    %61 = vector.shape_cast %60 : vector<1x64x16xf32> to vector<64x16xf32>
    %cst_29 = arith.constant dense<0.000000e+00> : vector<16x16xf32>
    %62 = tpu.matmul %57, %61, %cst_29 {dimension_numbers = #tpu.dot_dimension_numbers<[1], [0], [0], [1], [0, 0, 1, 1], [], []>} : vector<16x64xf32>, vector<64x16xf32>, vector<16x16xf32> -> vector<16x16xf32>
    %c0_30 = arith.constant 0 : index
    %c0_31 = arith.constant 0 : index
    %c0_32 = arith.constant 0 : index
    %63 = vector.load %arg11[%c0_30, %c0_31, %c0_32] : memref<4x1x16xf32, #tpu.memory_space<vmem>>, vector<1x1x16xf32>
    %64 = vector.shape_cast %63 : vector<1x1x16xf32> to vector<1x16xf32>
    %65 = vector.broadcast %64 : vector<1x16xf32> to vector<16x16xf32>
    %66 = arith.addf %62, %65 : vector<16x16xf32>
    %c0_33 = arith.constant 0 : index
    %c0_34 = arith.constant 0 : index
    %c0_35 = arith.constant 0 : index
    %67 = vector.load %arg12[%c0_33, %c0_34, %c0_35] : memref<4x64x16xf32, #tpu.memory_space<vmem>>, vector<1x64x16xf32>
    %68 = vector.shape_cast %67 : vector<1x64x16xf32> to vector<64x16xf32>
    %cst_36 = arith.constant dense<0.000000e+00> : vector<16x16xf32>
    %69 = tpu.matmul %58, %68, %cst_36 {dimension_numbers = #tpu.dot_dimension_numbers<[1], [0], [0], [1], [0, 0, 1, 1], [], []>} : vector<16x64xf32>, vector<64x16xf32>, vector<16x16xf32> -> vector<16x16xf32>
    %c0_37 = arith.constant 0 : index
    %c0_38 = arith.constant 0 : index
    %c0_39 = arith.constant 0 : index
    %70 = vector.load %arg13[%c0_37, %c0_38, %c0_39] : memref<4x1x16xf32, #tpu.memory_space<vmem>>, vector<1x1x16xf32>
    %71 = vector.shape_cast %70 : vector<1x1x16xf32> to vector<1x16xf32>
    %72 = vector.broadcast %71 : vector<1x16xf32> to vector<16x16xf32>
    %73 = arith.addf %69, %72 : vector<16x16xf32>
    %c0_40 = arith.constant 0 : index
    %c0_41 = arith.constant 0 : index
    %c0_42 = arith.constant 0 : index
    %74 = vector.load %arg14[%c0_40, %c0_41, %c0_42] : memref<4x64x16xf32, #tpu.memory_space<vmem>>, vector<1x64x16xf32>
    %75 = vector.shape_cast %74 : vector<1x64x16xf32> to vector<64x16xf32>
    %cst_43 = arith.constant dense<0.000000e+00> : vector<16x16xf32>
    %76 = tpu.matmul %58, %75, %cst_43 {dimension_numbers = #tpu.dot_dimension_numbers<[1], [0], [0], [1], [0, 0, 1, 1], [], []>} : vector<16x64xf32>, vector<64x16xf32>, vector<16x16xf32> -> vector<16x16xf32>
    %c0_44 = arith.constant 0 : index
    %c0_45 = arith.constant 0 : index
    %c0_46 = arith.constant 0 : index
    %77 = vector.load %arg15[%c0_44, %c0_45, %c0_46] : memref<4x1x16xf32, #tpu.memory_space<vmem>>, vector<1x1x16xf32>
    %78 = vector.shape_cast %77 : vector<1x1x16xf32> to vector<1x16xf32>
    %79 = vector.broadcast %78 : vector<1x16xf32> to vector<16x16xf32>
    %80 = arith.addf %76, %79 : vector<16x16xf32>
    %cst_47 = arith.constant dense<0.000000e+00> : vector<16x16xf32>
    %81 = tpu.matmul %66, %73, %cst_47 {dimension_numbers = #tpu.dot_dimension_numbers<[1], [1], [0], [0], [0, 0, 1, 0], [], []>} : vector<16x16xf32>, vector<16x16xf32>, vector<16x16xf32> -> vector<16x16xf32>
    %cst_48 = arith.constant 2.500000e-01 : f32
    %82 = vector.broadcast %cst_48 : f32 to vector<16x16xf32>
    %83 = arith.mulf %81, %82 : vector<16x16xf32>
    %84 = arith.addf %83, %59 : vector<16x16xf32>
    %cst_49 = arith.constant dense<0xFF800000> : vector<16xf32>
    %85 = vector.multi_reduction <maximumf>, %84, %cst_49 [1] : vector<16x16xf32> to vector<16xf32>
    %86 = vector.shape_cast %85 : vector<16xf32> to vector<16x1xf32>
    %87 = vector.broadcast %86 : vector<16x1xf32> to vector<16x16xf32>
    %88 = arith.subf %84, %87 : vector<16x16xf32>
    %89 = math.exp %88 : vector<16x16xf32>
    %cst_50 = arith.constant dense<0.000000e+00> : vector<16xf32>
    %90 = vector.multi_reduction <add>, %89, %cst_50 [1] : vector<16x16xf32> to vector<16xf32>
    %91 = vector.shape_cast %90 : vector<16xf32> to vector<16x1xf32>
    %92 = tpu.reciprocal %91 {approx = true} : vector<16x1xf32> -> vector<16x1xf32>
    %93 = vector.broadcast %92 : vector<16x1xf32> to vector<16x16xf32>
    %94 = arith.mulf %89, %93 : vector<16x16xf32>
    %cst_51 = arith.constant dense<0.000000e+00> : vector<16x16xf32>
    %95 = tpu.matmul %94, %80, %cst_51 {dimension_numbers = #tpu.dot_dimension_numbers<[1], [0], [0], [1], [0, 0, 1, 1], [], []>} : vector<16x16xf32>, vector<16x16xf32>, vector<16x16xf32> -> vector<16x16xf32>
    %c0_52 = arith.constant 0 : index
    %c0_53 = arith.constant 0 : index
    %c0_54 = arith.constant 0 : index
    %96 = vector.load %arg16[%c0_52, %c0_53, %c0_54] : memref<4x16x64xf32, #tpu.memory_space<vmem>>, vector<1x16x64xf32>
    %97 = vector.shape_cast %96 : vector<1x16x64xf32> to vector<16x64xf32>
    %cst_55 = arith.constant dense<0.000000e+00> : vector<16x64xf32>
    %98 = tpu.matmul %95, %97, %cst_55 {dimension_numbers = #tpu.dot_dimension_numbers<[1], [0], [0], [1], [0, 0, 1, 1], [], []>} : vector<16x16xf32>, vector<16x64xf32>, vector<16x64xf32> -> vector<16x64xf32>
    %c1 = arith.constant 1 : index
    %c0_56 = arith.constant 0 : index
    %c0_57 = arith.constant 0 : index
    %99 = vector.load %arg10[%c1, %c0_56, %c0_57] : memref<4x64x16xf32, #tpu.memory_space<vmem>>, vector<1x64x16xf32>
    %100 = vector.shape_cast %99 : vector<1x64x16xf32> to vector<64x16xf32>
    %cst_58 = arith.constant dense<0.000000e+00> : vector<16x16xf32>
    %101 = tpu.matmul %57, %100, %cst_58 {dimension_numbers = #tpu.dot_dimension_numbers<[1], [0], [0], [1], [0, 0, 1, 1], [], []>} : vector<16x64xf32>, vector<64x16xf32>, vector<16x16xf32> -> vector<16x16xf32>
    %c1_59 = arith.constant 1 : index
    %c0_60 = arith.constant 0 : index
    %c0_61 = arith.constant 0 : index
    %102 = vector.load %arg11[%c1_59, %c0_60, %c0_61] : memref<4x1x16xf32, #tpu.memory_space<vmem>>, vector<1x1x16xf32>
    %103 = vector.shape_cast %102 : vector<1x1x16xf32> to vector<1x16xf32>
    %104 = vector.broadcast %103 : vector<1x16xf32> to vector<16x16xf32>
    %105 = arith.addf %101, %104 : vector<16x16xf32>
    %c1_62 = arith.constant 1 : index
    %c0_63 = arith.constant 0 : index
    %c0_64 = arith.constant 0 : index
    %106 = vector.load %arg12[%c1_62, %c0_63, %c0_64] : memref<4x64x16xf32, #tpu.memory_space<vmem>>, vector<1x64x16xf32>
    %107 = vector.shape_cast %106 : vector<1x64x16xf32> to vector<64x16xf32>
    %cst_65 = arith.constant dense<0.000000e+00> : vector<16x16xf32>
    %108 = tpu.matmul %58, %107, %cst_65 {dimension_numbers = #tpu.dot_dimension_numbers<[1], [0], [0], [1], [0, 0, 1, 1], [], []>} : vector<16x64xf32>, vector<64x16xf32>, vector<16x16xf32> -> vector<16x16xf32>
    %c1_66 = arith.constant 1 : index
    %c0_67 = arith.constant 0 : index
    %c0_68 = arith.constant 0 : index
    %109 = vector.load %arg13[%c1_66, %c0_67, %c0_68] : memref<4x1x16xf32, #tpu.memory_space<vmem>>, vector<1x1x16xf32>
    %110 = vector.shape_cast %109 : vector<1x1x16xf32> to vector<1x16xf32>
    %111 = vector.broadcast %110 : vector<1x16xf32> to vector<16x16xf32>
    %112 = arith.addf %108, %111 : vector<16x16xf32>
    %c1_69 = arith.constant 1 : index
    %c0_70 = arith.constant 0 : index
    %c0_71 = arith.constant 0 : index
    %113 = vector.load %arg14[%c1_69, %c0_70, %c0_71] : memref<4x64x16xf32, #tpu.memory_space<vmem>>, vector<1x64x16xf32>
    %114 = vector.shape_cast %113 : vector<1x64x16xf32> to vector<64x16xf32>
    %cst_72 = arith.constant dense<0.000000e+00> : vector<16x16xf32>
    %115 = tpu.matmul %58, %114, %cst_72 {dimension_numbers = #tpu.dot_dimension_numbers<[1], [0], [0], [1], [0, 0, 1, 1], [], []>} : vector<16x64xf32>, vector<64x16xf32>, vector<16x16xf32> -> vector<16x16xf32>
    %c1_73 = arith.constant 1 : index
    %c0_74 = arith.constant 0 : index
    %c0_75 = arith.constant 0 : index
    %116 = vector.load %arg15[%c1_73, %c0_74, %c0_75] : memref<4x1x16xf32, #tpu.memory_space<vmem>>, vector<1x1x16xf32>
    %117 = vector.shape_cast %116 : vector<1x1x16xf32> to vector<1x16xf32>
    %118 = vector.broadcast %117 : vector<1x16xf32> to vector<16x16xf32>
    %119 = arith.addf %115, %118 : vector<16x16xf32>
    %cst_76 = arith.constant dense<0.000000e+00> : vector<16x16xf32>
    %120 = tpu.matmul %105, %112, %cst_76 {dimension_numbers = #tpu.dot_dimension_numbers<[1], [1], [0], [0], [0, 0, 1, 0], [], []>} : vector<16x16xf32>, vector<16x16xf32>, vector<16x16xf32> -> vector<16x16xf32>
    %cst_77 = arith.constant 2.500000e-01 : f32
    %121 = vector.broadcast %cst_77 : f32 to vector<16x16xf32>
    %122 = arith.mulf %120, %121 : vector<16x16xf32>
    %123 = arith.addf %122, %59 : vector<16x16xf32>
    %cst_78 = arith.constant dense<0xFF800000> : vector<16xf32>
    %124 = vector.multi_reduction <maximumf>, %123, %cst_78 [1] : vector<16x16xf32> to vector<16xf32>
    %125 = vector.shape_cast %124 : vector<16xf32> to vector<16x1xf32>
    %126 = vector.broadcast %125 : vector<16x1xf32> to vector<16x16xf32>
    %127 = arith.subf %123, %126 : vector<16x16xf32>
    %128 = math.exp %127 : vector<16x16xf32>
    %cst_79 = arith.constant dense<0.000000e+00> : vector<16xf32>
    %129 = vector.multi_reduction <add>, %128, %cst_79 [1] : vector<16x16xf32> to vector<16xf32>
    %130 = vector.shape_cast %129 : vector<16xf32> to vector<16x1xf32>
    %131 = tpu.reciprocal %130 {approx = true} : vector<16x1xf32> -> vector<16x1xf32>
    %132 = vector.broadcast %131 : vector<16x1xf32> to vector<16x16xf32>
    %133 = arith.mulf %128, %132 : vector<16x16xf32>
    %cst_80 = arith.constant dense<0.000000e+00> : vector<16x16xf32>
    %134 = tpu.matmul %133, %119, %cst_80 {dimension_numbers = #tpu.dot_dimension_numbers<[1], [0], [0], [1], [0, 0, 1, 1], [], []>} : vector<16x16xf32>, vector<16x16xf32>, vector<16x16xf32> -> vector<16x16xf32>
    %c1_81 = arith.constant 1 : index
    %c0_82 = arith.constant 0 : index
    %c0_83 = arith.constant 0 : index
    %135 = vector.load %arg16[%c1_81, %c0_82, %c0_83] : memref<4x16x64xf32, #tpu.memory_space<vmem>>, vector<1x16x64xf32>
    %136 = vector.shape_cast %135 : vector<1x16x64xf32> to vector<16x64xf32>
    %cst_84 = arith.constant dense<0.000000e+00> : vector<16x64xf32>
    %137 = tpu.matmul %134, %136, %cst_84 {dimension_numbers = #tpu.dot_dimension_numbers<[1], [0], [0], [1], [0, 0, 1, 1], [], []>} : vector<16x16xf32>, vector<16x64xf32>, vector<16x64xf32> -> vector<16x64xf32>
    %138 = arith.addf %98, %137 : vector<16x64xf32>
    %c2 = arith.constant 2 : index
    %c0_85 = arith.constant 0 : index
    %c0_86 = arith.constant 0 : index
    %139 = vector.load %arg10[%c2, %c0_85, %c0_86] : memref<4x64x16xf32, #tpu.memory_space<vmem>>, vector<1x64x16xf32>
    %140 = vector.shape_cast %139 : vector<1x64x16xf32> to vector<64x16xf32>
    %cst_87 = arith.constant dense<0.000000e+00> : vector<16x16xf32>
    %141 = tpu.matmul %57, %140, %cst_87 {dimension_numbers = #tpu.dot_dimension_numbers<[1], [0], [0], [1], [0, 0, 1, 1], [], []>} : vector<16x64xf32>, vector<64x16xf32>, vector<16x16xf32> -> vector<16x16xf32>
    %c2_88 = arith.constant 2 : index
    %c0_89 = arith.constant 0 : index
    %c0_90 = arith.constant 0 : index
    %142 = vector.load %arg11[%c2_88, %c0_89, %c0_90] : memref<4x1x16xf32, #tpu.memory_space<vmem>>, vector<1x1x16xf32>
    %143 = vector.shape_cast %142 : vector<1x1x16xf32> to vector<1x16xf32>
    %144 = vector.broadcast %143 : vector<1x16xf32> to vector<16x16xf32>
    %145 = arith.addf %141, %144 : vector<16x16xf32>
    %c2_91 = arith.constant 2 : index
    %c0_92 = arith.constant 0 : index
    %c0_93 = arith.constant 0 : index
    %146 = vector.load %arg12[%c2_91, %c0_92, %c0_93] : memref<4x64x16xf32, #tpu.memory_space<vmem>>, vector<1x64x16xf32>
    %147 = vector.shape_cast %146 : vector<1x64x16xf32> to vector<64x16xf32>
    %cst_94 = arith.constant dense<0.000000e+00> : vector<16x16xf32>
    %148 = tpu.matmul %58, %147, %cst_94 {dimension_numbers = #tpu.dot_dimension_numbers<[1], [0], [0], [1], [0, 0, 1, 1], [], []>} : vector<16x64xf32>, vector<64x16xf32>, vector<16x16xf32> -> vector<16x16xf32>
    %c2_95 = arith.constant 2 : index
    %c0_96 = arith.constant 0 : index
    %c0_97 = arith.constant 0 : index
    %149 = vector.load %arg13[%c2_95, %c0_96, %c0_97] : memref<4x1x16xf32, #tpu.memory_space<vmem>>, vector<1x1x16xf32>
    %150 = vector.shape_cast %149 : vector<1x1x16xf32> to vector<1x16xf32>
    %151 = vector.broadcast %150 : vector<1x16xf32> to vector<16x16xf32>
    %152 = arith.addf %148, %151 : vector<16x16xf32>
    %c2_98 = arith.constant 2 : index
    %c0_99 = arith.constant 0 : index
    %c0_100 = arith.constant 0 : index
    %153 = vector.load %arg14[%c2_98, %c0_99, %c0_100] : memref<4x64x16xf32, #tpu.memory_space<vmem>>, vector<1x64x16xf32>
    %154 = vector.shape_cast %153 : vector<1x64x16xf32> to vector<64x16xf32>
    %cst_101 = arith.constant dense<0.000000e+00> : vector<16x16xf32>
    %155 = tpu.matmul %58, %154, %cst_101 {dimension_numbers = #tpu.dot_dimension_numbers<[1], [0], [0], [1], [0, 0, 1, 1], [], []>} : vector<16x64xf32>, vector<64x16xf32>, vector<16x16xf32> -> vector<16x16xf32>
    %c2_102 = arith.constant 2 : index
    %c0_103 = arith.constant 0 : index
    %c0_104 = arith.constant 0 : index
    %156 = vector.load %arg15[%c2_102, %c0_103, %c0_104] : memref<4x1x16xf32, #tpu.memory_space<vmem>>, vector<1x1x16xf32>
    %157 = vector.shape_cast %156 : vector<1x1x16xf32> to vector<1x16xf32>
    %158 = vector.broadcast %157 : vector<1x16xf32> to vector<16x16xf32>
    %159 = arith.addf %155, %158 : vector<16x16xf32>
    %cst_105 = arith.constant dense<0.000000e+00> : vector<16x16xf32>
    %160 = tpu.matmul %145, %152, %cst_105 {dimension_numbers = #tpu.dot_dimension_numbers<[1], [1], [0], [0], [0, 0, 1, 0], [], []>} : vector<16x16xf32>, vector<16x16xf32>, vector<16x16xf32> -> vector<16x16xf32>
    %cst_106 = arith.constant 2.500000e-01 : f32
    %161 = vector.broadcast %cst_106 : f32 to vector<16x16xf32>
    %162 = arith.mulf %160, %161 : vector<16x16xf32>
    %163 = arith.addf %162, %59 : vector<16x16xf32>
    %cst_107 = arith.constant dense<0xFF800000> : vector<16xf32>
    %164 = vector.multi_reduction <maximumf>, %163, %cst_107 [1] : vector<16x16xf32> to vector<16xf32>
    %165 = vector.shape_cast %164 : vector<16xf32> to vector<16x1xf32>
    %166 = vector.broadcast %165 : vector<16x1xf32> to vector<16x16xf32>
    %167 = arith.subf %163, %166 : vector<16x16xf32>
    %168 = math.exp %167 : vector<16x16xf32>
    %cst_108 = arith.constant dense<0.000000e+00> : vector<16xf32>
    %169 = vector.multi_reduction <add>, %168, %cst_108 [1] : vector<16x16xf32> to vector<16xf32>
    %170 = vector.shape_cast %169 : vector<16xf32> to vector<16x1xf32>
    %171 = tpu.reciprocal %170 {approx = true} : vector<16x1xf32> -> vector<16x1xf32>
    %172 = vector.broadcast %171 : vector<16x1xf32> to vector<16x16xf32>
    %173 = arith.mulf %168, %172 : vector<16x16xf32>
    %cst_109 = arith.constant dense<0.000000e+00> : vector<16x16xf32>
    %174 = tpu.matmul %173, %159, %cst_109 {dimension_numbers = #tpu.dot_dimension_numbers<[1], [0], [0], [1], [0, 0, 1, 1], [], []>} : vector<16x16xf32>, vector<16x16xf32>, vector<16x16xf32> -> vector<16x16xf32>
    %c2_110 = arith.constant 2 : index
    %c0_111 = arith.constant 0 : index
    %c0_112 = arith.constant 0 : index
    %175 = vector.load %arg16[%c2_110, %c0_111, %c0_112] : memref<4x16x64xf32, #tpu.memory_space<vmem>>, vector<1x16x64xf32>
    %176 = vector.shape_cast %175 : vector<1x16x64xf32> to vector<16x64xf32>
    %cst_113 = arith.constant dense<0.000000e+00> : vector<16x64xf32>
    %177 = tpu.matmul %174, %176, %cst_113 {dimension_numbers = #tpu.dot_dimension_numbers<[1], [0], [0], [1], [0, 0, 1, 1], [], []>} : vector<16x16xf32>, vector<16x64xf32>, vector<16x64xf32> -> vector<16x64xf32>
    %178 = arith.addf %138, %177 : vector<16x64xf32>
    %c3 = arith.constant 3 : index
    %c0_114 = arith.constant 0 : index
    %c0_115 = arith.constant 0 : index
    %179 = vector.load %arg10[%c3, %c0_114, %c0_115] : memref<4x64x16xf32, #tpu.memory_space<vmem>>, vector<1x64x16xf32>
    %180 = vector.shape_cast %179 : vector<1x64x16xf32> to vector<64x16xf32>
    %cst_116 = arith.constant dense<0.000000e+00> : vector<16x16xf32>
    %181 = tpu.matmul %57, %180, %cst_116 {dimension_numbers = #tpu.dot_dimension_numbers<[1], [0], [0], [1], [0, 0, 1, 1], [], []>} : vector<16x64xf32>, vector<64x16xf32>, vector<16x16xf32> -> vector<16x16xf32>
    %c3_117 = arith.constant 3 : index
    %c0_118 = arith.constant 0 : index
    %c0_119 = arith.constant 0 : index
    %182 = vector.load %arg11[%c3_117, %c0_118, %c0_119] : memref<4x1x16xf32, #tpu.memory_space<vmem>>, vector<1x1x16xf32>
    %183 = vector.shape_cast %182 : vector<1x1x16xf32> to vector<1x16xf32>
    %184 = vector.broadcast %183 : vector<1x16xf32> to vector<16x16xf32>
    %185 = arith.addf %181, %184 : vector<16x16xf32>
    %c3_120 = arith.constant 3 : index
    %c0_121 = arith.constant 0 : index
    %c0_122 = arith.constant 0 : index
    %186 = vector.load %arg12[%c3_120, %c0_121, %c0_122] : memref<4x64x16xf32, #tpu.memory_space<vmem>>, vector<1x64x16xf32>
    %187 = vector.shape_cast %186 : vector<1x64x16xf32> to vector<64x16xf32>
    %cst_123 = arith.constant dense<0.000000e+00> : vector<16x16xf32>
    %188 = tpu.matmul %58, %187, %cst_123 {dimension_numbers = #tpu.dot_dimension_numbers<[1], [0], [0], [1], [0, 0, 1, 1], [], []>} : vector<16x64xf32>, vector<64x16xf32>, vector<16x16xf32> -> vector<16x16xf32>
    %c3_124 = arith.constant 3 : index
    %c0_125 = arith.constant 0 : index
    %c0_126 = arith.constant 0 : index
    %189 = vector.load %arg13[%c3_124, %c0_125, %c0_126] : memref<4x1x16xf32, #tpu.memory_space<vmem>>, vector<1x1x16xf32>
    %190 = vector.shape_cast %189 : vector<1x1x16xf32> to vector<1x16xf32>
    %191 = vector.broadcast %190 : vector<1x16xf32> to vector<16x16xf32>
    %192 = arith.addf %188, %191 : vector<16x16xf32>
    %c3_127 = arith.constant 3 : index
    %c0_128 = arith.constant 0 : index
    %c0_129 = arith.constant 0 : index
    %193 = vector.load %arg14[%c3_127, %c0_128, %c0_129] : memref<4x64x16xf32, #tpu.memory_space<vmem>>, vector<1x64x16xf32>
    %194 = vector.shape_cast %193 : vector<1x64x16xf32> to vector<64x16xf32>
    %cst_130 = arith.constant dense<0.000000e+00> : vector<16x16xf32>
    %195 = tpu.matmul %58, %194, %cst_130 {dimension_numbers = #tpu.dot_dimension_numbers<[1], [0], [0], [1], [0, 0, 1, 1], [], []>} : vector<16x64xf32>, vector<64x16xf32>, vector<16x16xf32> -> vector<16x16xf32>
    %c3_131 = arith.constant 3 : index
    %c0_132 = arith.constant 0 : index
    %c0_133 = arith.constant 0 : index
    %196 = vector.load %arg15[%c3_131, %c0_132, %c0_133] : memref<4x1x16xf32, #tpu.memory_space<vmem>>, vector<1x1x16xf32>
    %197 = vector.shape_cast %196 : vector<1x1x16xf32> to vector<1x16xf32>
    %198 = vector.broadcast %197 : vector<1x16xf32> to vector<16x16xf32>
    %199 = arith.addf %195, %198 : vector<16x16xf32>
    %cst_134 = arith.constant dense<0.000000e+00> : vector<16x16xf32>
    %200 = tpu.matmul %185, %192, %cst_134 {dimension_numbers = #tpu.dot_dimension_numbers<[1], [1], [0], [0], [0, 0, 1, 0], [], []>} : vector<16x16xf32>, vector<16x16xf32>, vector<16x16xf32> -> vector<16x16xf32>
    %cst_135 = arith.constant 2.500000e-01 : f32
    %201 = vector.broadcast %cst_135 : f32 to vector<16x16xf32>
    %202 = arith.mulf %200, %201 : vector<16x16xf32>
    %203 = arith.addf %202, %59 : vector<16x16xf32>
    %cst_136 = arith.constant dense<0xFF800000> : vector<16xf32>
    %204 = vector.multi_reduction <maximumf>, %203, %cst_136 [1] : vector<16x16xf32> to vector<16xf32>
    %205 = vector.shape_cast %204 : vector<16xf32> to vector<16x1xf32>
    %206 = vector.broadcast %205 : vector<16x1xf32> to vector<16x16xf32>
    %207 = arith.subf %203, %206 : vector<16x16xf32>
    %208 = math.exp %207 : vector<16x16xf32>
    %cst_137 = arith.constant dense<0.000000e+00> : vector<16xf32>
    %209 = vector.multi_reduction <add>, %208, %cst_137 [1] : vector<16x16xf32> to vector<16xf32>
    %210 = vector.shape_cast %209 : vector<16xf32> to vector<16x1xf32>
    %211 = tpu.reciprocal %210 {approx = true} : vector<16x1xf32> -> vector<16x1xf32>
    %212 = vector.broadcast %211 : vector<16x1xf32> to vector<16x16xf32>
    %213 = arith.mulf %208, %212 : vector<16x16xf32>
    %cst_138 = arith.constant dense<0.000000e+00> : vector<16x16xf32>
    %214 = tpu.matmul %213, %199, %cst_138 {dimension_numbers = #tpu.dot_dimension_numbers<[1], [0], [0], [1], [0, 0, 1, 1], [], []>} : vector<16x16xf32>, vector<16x16xf32>, vector<16x16xf32> -> vector<16x16xf32>
    %c3_139 = arith.constant 3 : index
    %c0_140 = arith.constant 0 : index
    %c0_141 = arith.constant 0 : index
    %215 = vector.load %arg16[%c3_139, %c0_140, %c0_141] : memref<4x16x64xf32, #tpu.memory_space<vmem>>, vector<1x16x64xf32>
    %216 = vector.shape_cast %215 : vector<1x16x64xf32> to vector<16x64xf32>
    %cst_142 = arith.constant dense<0.000000e+00> : vector<16x64xf32>
    %217 = tpu.matmul %214, %216, %cst_142 {dimension_numbers = #tpu.dot_dimension_numbers<[1], [0], [0], [1], [0, 0, 1, 1], [], []>} : vector<16x16xf32>, vector<16x64xf32>, vector<16x64xf32> -> vector<16x64xf32>
    %218 = arith.addf %178, %217 : vector<16x64xf32>
    %c0_143 = arith.constant 0 : index
    %c0_144 = arith.constant 0 : index
    %219 = vector.load %arg17[%c0_143, %c0_144] : memref<1x64xf32, #tpu.memory_space<vmem>>, vector<1x64xf32>
    %220 = vector.broadcast %219 : vector<1x64xf32> to vector<16x64xf32>
    %221 = arith.addf %218, %220 : vector<16x64xf32>
    %c0_145 = arith.constant 0 : index
    %c0_146 = arith.constant 0 : index
    %222 = vector.load %arg18[%c0_145, %c0_146] : memref<64x256xf32, #tpu.memory_space<vmem>>, vector<64x256xf32>
    %cst_147 = arith.constant dense<0.000000e+00> : vector<16x256xf32>
    %223 = tpu.matmul %221, %222, %cst_147 {dimension_numbers = #tpu.dot_dimension_numbers<[1], [0], [0], [1], [0, 0, 1, 1], [], []>} : vector<16x64xf32>, vector<64x256xf32>, vector<16x256xf32> -> vector<16x256xf32>
    %c0_148 = arith.constant 0 : index
    %c0_149 = arith.constant 0 : index
    %224 = vector.load %arg19[%c0_148, %c0_149] : memref<1x256xf32, #tpu.memory_space<vmem>>, vector<1x256xf32>
    %225 = vector.broadcast %224 : vector<1x256xf32> to vector<16x256xf32>
    %226 = arith.addf %223, %225 : vector<16x256xf32>
    %cst_150 = arith.constant 0.000000e+00 : f32
    %227 = vector.broadcast %cst_150 : f32 to vector<16x256xf32>
    %228 = arith.maximumf %226, %227 : vector<16x256xf32>
    %c0_151 = arith.constant 0 : index
    %c0_152 = arith.constant 0 : index
    %229 = vector.load %arg20[%c0_151, %c0_152] : memref<1x256xf32, #tpu.memory_space<vmem>>, vector<1x256xf32>
    %c0_153 = arith.constant 0 : index
    %c0_154 = arith.constant 0 : index
    %230 = vector.load %arg21[%c0_153, %c0_154] : memref<1x256xf32, #tpu.memory_space<vmem>>, vector<1x256xf32>
    %cst_155 = arith.constant dense<0.000000e+00> : vector<16xf32>
    %231 = vector.multi_reduction <add>, %228, %cst_155 [1] : vector<16x256xf32> to vector<16xf32>
    %232 = vector.shape_cast %231 : vector<16xf32> to vector<16x1xf32>
    %233 = arith.mulf %228, %228 : vector<16x256xf32>
    %cst_156 = arith.constant dense<0.000000e+00> : vector<16xf32>
    %234 = vector.multi_reduction <add>, %233, %cst_156 [1] : vector<16x256xf32> to vector<16xf32>
    %235 = vector.shape_cast %234 : vector<16xf32> to vector<16x1xf32>
    %cst_157 = arith.constant 3.906250e-03 : f32
    %236 = vector.broadcast %cst_157 : f32 to vector<16x1xf32>
    %237 = arith.mulf %232, %236 : vector<16x1xf32>
    %cst_158 = arith.constant 3.906250e-03 : f32
    %238 = vector.broadcast %cst_158 : f32 to vector<16x1xf32>
    %239 = arith.mulf %235, %238 : vector<16x1xf32>
    %240 = arith.mulf %237, %237 : vector<16x1xf32>
    %241 = arith.subf %239, %240 : vector<16x1xf32>
    %cst_159 = arith.constant 9.99999974E-6 : f32
    %242 = vector.broadcast %cst_159 : f32 to vector<16x1xf32>
    %243 = arith.addf %241, %242 : vector<16x1xf32>
    %244 = math.rsqrt %243 : vector<16x1xf32>
    %245 = vector.broadcast %237 : vector<16x1xf32> to vector<16x256xf32>
    %246 = arith.subf %228, %245 : vector<16x256xf32>
    %247 = vector.broadcast %244 : vector<16x1xf32> to vector<16x256xf32>
    %248 = arith.mulf %246, %247 : vector<16x256xf32>
    %249 = vector.broadcast %229 : vector<1x256xf32> to vector<16x256xf32>
    %250 = arith.mulf %248, %249 : vector<16x256xf32>
    %251 = vector.broadcast %230 : vector<1x256xf32> to vector<16x256xf32>
    %252 = arith.addf %250, %251 : vector<16x256xf32>
    %c0_160 = arith.constant 0 : index
    %c0_161 = arith.constant 0 : index
    %253 = vector.load %arg22[%c0_160, %c0_161] : memref<256x128xf32, #tpu.memory_space<vmem>>, vector<256x128xf32>
    %cst_162 = arith.constant dense<0.000000e+00> : vector<16x128xf32>
    %254 = tpu.matmul %252, %253, %cst_162 {dimension_numbers = #tpu.dot_dimension_numbers<[1], [0], [0], [1], [0, 0, 1, 1], [], []>} : vector<16x256xf32>, vector<256x128xf32>, vector<16x128xf32> -> vector<16x128xf32>
    %c0_163 = arith.constant 0 : index
    %c0_164 = arith.constant 0 : index
    %255 = vector.load %arg23[%c0_163, %c0_164] : memref<1x128xf32, #tpu.memory_space<vmem>>, vector<1x128xf32>
    %256 = vector.broadcast %255 : vector<1x128xf32> to vector<16x128xf32>
    %257 = arith.addf %254, %256 : vector<16x128xf32>
    %cst_165 = arith.constant 0.000000e+00 : f32
    %258 = vector.broadcast %cst_165 : f32 to vector<16x128xf32>
    %259 = arith.maximumf %257, %258 : vector<16x128xf32>
    %c0_166 = arith.constant 0 : index
    %c0_167 = arith.constant 0 : index
    %260 = vector.load %arg24[%c0_166, %c0_167] : memref<1x128xf32, #tpu.memory_space<vmem>>, vector<1x128xf32>
    %c0_168 = arith.constant 0 : index
    %c0_169 = arith.constant 0 : index
    %261 = vector.load %arg25[%c0_168, %c0_169] : memref<1x128xf32, #tpu.memory_space<vmem>>, vector<1x128xf32>
    %cst_170 = arith.constant dense<0.000000e+00> : vector<16xf32>
    %262 = vector.multi_reduction <add>, %259, %cst_170 [1] : vector<16x128xf32> to vector<16xf32>
    %263 = vector.shape_cast %262 : vector<16xf32> to vector<16x1xf32>
    %264 = arith.mulf %259, %259 : vector<16x128xf32>
    %cst_171 = arith.constant dense<0.000000e+00> : vector<16xf32>
    %265 = vector.multi_reduction <add>, %264, %cst_171 [1] : vector<16x128xf32> to vector<16xf32>
    %266 = vector.shape_cast %265 : vector<16xf32> to vector<16x1xf32>
    %cst_172 = arith.constant 7.812500e-03 : f32
    %267 = vector.broadcast %cst_172 : f32 to vector<16x1xf32>
    %268 = arith.mulf %263, %267 : vector<16x1xf32>
    %cst_173 = arith.constant 7.812500e-03 : f32
    %269 = vector.broadcast %cst_173 : f32 to vector<16x1xf32>
    %270 = arith.mulf %266, %269 : vector<16x1xf32>
    %271 = arith.mulf %268, %268 : vector<16x1xf32>
    %272 = arith.subf %270, %271 : vector<16x1xf32>
    %cst_174 = arith.constant 9.99999974E-6 : f32
    %273 = vector.broadcast %cst_174 : f32 to vector<16x1xf32>
    %274 = arith.addf %272, %273 : vector<16x1xf32>
    %275 = math.rsqrt %274 : vector<16x1xf32>
    %276 = vector.broadcast %268 : vector<16x1xf32> to vector<16x128xf32>
    %277 = arith.subf %259, %276 : vector<16x128xf32>
    %278 = vector.broadcast %275 : vector<16x1xf32> to vector<16x128xf32>
    %279 = arith.mulf %277, %278 : vector<16x128xf32>
    %280 = vector.broadcast %260 : vector<1x128xf32> to vector<16x128xf32>
    %281 = arith.mulf %279, %280 : vector<16x128xf32>
    %282 = vector.broadcast %261 : vector<1x128xf32> to vector<16x128xf32>
    %283 = arith.addf %281, %282 : vector<16x128xf32>
    %c0_175 = arith.constant 0 : index
    %c0_176 = arith.constant 0 : index
    %284 = vector.load %arg26[%c0_175, %c0_176] : memref<128x64xf32, #tpu.memory_space<vmem>>, vector<128x64xf32>
    %cst_177 = arith.constant dense<0.000000e+00> : vector<16x64xf32>
    %285 = tpu.matmul %283, %284, %cst_177 {dimension_numbers = #tpu.dot_dimension_numbers<[1], [0], [0], [1], [0, 0, 1, 1], [], []>} : vector<16x128xf32>, vector<128x64xf32>, vector<16x64xf32> -> vector<16x64xf32>
    %c0_178 = arith.constant 0 : index
    %c0_179 = arith.constant 0 : index
    %286 = vector.load %arg27[%c0_178, %c0_179] : memref<1x64xf32, #tpu.memory_space<vmem>>, vector<1x64xf32>
    %287 = vector.broadcast %286 : vector<1x64xf32> to vector<16x64xf32>
    %288 = arith.addf %285, %287 : vector<16x64xf32>
    %cst_180 = arith.constant 0.000000e+00 : f32
    %289 = vector.broadcast %cst_180 : f32 to vector<16x64xf32>
    %290 = arith.maximumf %288, %289 : vector<16x64xf32>
    %c0_181 = arith.constant 0 : index
    %c0_182 = arith.constant 0 : index
    %291 = vector.load %arg28[%c0_181, %c0_182] : memref<1x64xf32, #tpu.memory_space<vmem>>, vector<1x64xf32>
    %c0_183 = arith.constant 0 : index
    %c0_184 = arith.constant 0 : index
    %292 = vector.load %arg29[%c0_183, %c0_184] : memref<1x64xf32, #tpu.memory_space<vmem>>, vector<1x64xf32>
    %cst_185 = arith.constant dense<0.000000e+00> : vector<16xf32>
    %293 = vector.multi_reduction <add>, %290, %cst_185 [1] : vector<16x64xf32> to vector<16xf32>
    %294 = vector.shape_cast %293 : vector<16xf32> to vector<16x1xf32>
    %295 = arith.mulf %290, %290 : vector<16x64xf32>
    %cst_186 = arith.constant dense<0.000000e+00> : vector<16xf32>
    %296 = vector.multi_reduction <add>, %295, %cst_186 [1] : vector<16x64xf32> to vector<16xf32>
    %297 = vector.shape_cast %296 : vector<16xf32> to vector<16x1xf32>
    %cst_187 = arith.constant 1.562500e-02 : f32
    %298 = vector.broadcast %cst_187 : f32 to vector<16x1xf32>
    %299 = arith.mulf %294, %298 : vector<16x1xf32>
    %cst_188 = arith.constant 1.562500e-02 : f32
    %300 = vector.broadcast %cst_188 : f32 to vector<16x1xf32>
    %301 = arith.mulf %297, %300 : vector<16x1xf32>
    %302 = arith.mulf %299, %299 : vector<16x1xf32>
    %303 = arith.subf %301, %302 : vector<16x1xf32>
    %cst_189 = arith.constant 9.99999974E-6 : f32
    %304 = vector.broadcast %cst_189 : f32 to vector<16x1xf32>
    %305 = arith.addf %303, %304 : vector<16x1xf32>
    %306 = math.rsqrt %305 : vector<16x1xf32>
    %307 = vector.broadcast %299 : vector<16x1xf32> to vector<16x64xf32>
    %308 = arith.subf %290, %307 : vector<16x64xf32>
    %309 = vector.broadcast %306 : vector<16x1xf32> to vector<16x64xf32>
    %310 = arith.mulf %308, %309 : vector<16x64xf32>
    %311 = vector.broadcast %291 : vector<1x64xf32> to vector<16x64xf32>
    %312 = arith.mulf %310, %311 : vector<16x64xf32>
    %313 = vector.broadcast %292 : vector<1x64xf32> to vector<16x64xf32>
    %314 = arith.addf %312, %313 : vector<16x64xf32>
    %c0_190 = arith.constant 0 : index
    %c0_191 = arith.constant 0 : index
    %315 = vector.load %arg30[%c0_190, %c0_191] : memref<1x64xf32, #tpu.memory_space<vmem>>, vector<1x64xf32>
    %cst_192 = arith.constant dense<0.000000e+00> : vector<1x16xf32>
    %316 = tpu.matmul %315, %29, %cst_192 {dimension_numbers = #tpu.dot_dimension_numbers<[1], [1], [0], [0], [0, 0, 1, 0], [], []>} : vector<1x64xf32>, vector<16x64xf32>, vector<1x16xf32> -> vector<1x16xf32>
    %c0_193 = arith.constant 0 : index
    %c0_194 = arith.constant 0 : index
    %317 = vector.load %arg31[%c0_193, %c0_194] : memref<1x64xf32, #tpu.memory_space<vmem>>, vector<1x64xf32>
    %cst_195 = arith.constant dense<0.000000e+00> : vector<1x16xf32>
    %318 = tpu.matmul %317, %314, %cst_195 {dimension_numbers = #tpu.dot_dimension_numbers<[1], [1], [0], [0], [0, 0, 1, 0], [], []>} : vector<1x64xf32>, vector<16x64xf32>, vector<1x16xf32> -> vector<1x16xf32>
    %319 = arith.addf %316, %318 : vector<1x16xf32>
    %c0_196 = arith.constant 0 : index
    %c0_197 = arith.constant 0 : index
    %320 = vector.load %arg32[%c0_196, %c0_197] : memref<1x1xf32, #tpu.memory_space<vmem>>, vector<1x1xf32>
    %321 = vector.broadcast %320 : vector<1x1xf32> to vector<1x16xf32>
    %322 = arith.addf %319, %321 : vector<1x16xf32>
    %323 = arith.negf %322 : vector<1x16xf32>
    %324 = math.exp %323 : vector<1x16xf32>
    %cst_198 = arith.constant 1.000000e+00 : f32
    %325 = vector.broadcast %cst_198 : f32 to vector<1x16xf32>
    %326 = arith.addf %325, %324 : vector<1x16xf32>
    %327 = arith.divf %325, %326 : vector<1x16xf32>
    %328 = vector.shape_cast %327 : vector<1x16xf32> to vector<1x1x16xf32>
    %c0_199 = arith.constant 0 : index
    %c0_200 = arith.constant 0 : index
    %c0_201 = arith.constant 0 : index
    %329 = vector.load %arg33[%c0_199, %c0_200, %c0_201] : memref<1x1x16xf32, #tpu.memory_space<vmem>>, vector<1x1x16xf32>
    tpu.vector_store %arg33[%c0_199, %c0_200, %c0_201], %328 {strides = array<i32>} : memref<1x1x16xf32, #tpu.memory_space<vmem>>, vector<1x1x16xf32>,
    return
  }
  func.func @transform_0(%arg0: i32) -> (i32, i32) {
    %c0_i32 = arith.constant 0 : i32
    %c0_i32_0 = arith.constant 0 : i32
    return %arg0, %c0_i32 : i32, i32
  }
  func.func @transform_1(%arg0: i32) -> (i32, i32) {
    %c0_i32 = arith.constant 0 : i32
    %c0_i32_0 = arith.constant 0 : i32
    return %arg0, %c0_i32 : i32, i32
  }
  func.func @transform_2(%arg0: i32) -> (i32, i32) {
    %c0_i32 = arith.constant 0 : i32
    %c0_i32_0 = arith.constant 0 : i32
    return %arg0, %c0_i32 : i32, i32
  }
  func.func @transform_3(%arg0: i32) -> (i32, i32) {
    %c0_i32 = arith.constant 0 : i32
    %c0_i32_0 = arith.constant 0 : i32
    return %arg0, %c0_i32 : i32, i32
  }
  func.func @transform_4(%arg0: i32) -> (i32, i32) {
    %c0_i32 = arith.constant 0 : i32
    %c0_i32_0 = arith.constant 0 : i32
    %c0_i32_1 = arith.constant 0 : i32
    return %c0_i32, %c0_i32_0 : i32, i32
  }
  func.func @transform_5(%arg0: i32) -> (i32, i32) {
    %c0_i32 = arith.constant 0 : i32
    %c0_i32_0 = arith.constant 0 : i32
    %c0_i32_1 = arith.constant 0 : i32
    return %c0_i32, %c0_i32_0 : i32, i32
  }
  func.func @transform_6(%arg0: i32) -> (i32, i32) {
    %c0_i32 = arith.constant 0 : i32
    %c0_i32_0 = arith.constant 0 : i32
    %c0_i32_1 = arith.constant 0 : i32
    return %c0_i32, %c0_i32_0 : i32, i32
  }
  func.func @transform_7(%arg0: i32) -> (i32, i32) {
    %c0_i32 = arith.constant 0 : i32
    %c0_i32_0 = arith.constant 0 : i32
    %c0_i32_1 = arith.constant 0 : i32
    return %c0_i32, %c0_i32_0 : i32, i32
  }
  func.func @transform_8(%arg0: i32) -> (i32, i32) {
    %c0_i32 = arith.constant 0 : i32
    %c0_i32_0 = arith.constant 0 : i32
    %c0_i32_1 = arith.constant 0 : i32
    return %c0_i32, %c0_i32_0 : i32, i32
  }
  func.func @transform_9(%arg0: i32) -> (i32, i32, i32) {
    %c0_i32 = arith.constant 0 : i32
    %c0_i32_0 = arith.constant 0 : i32
    %c0_i32_1 = arith.constant 0 : i32
    %c0_i32_2 = arith.constant 0 : i32
    return %c0_i32, %c0_i32_0, %c0_i32_1 : i32, i32, i32
  }
  func.func @transform_10(%arg0: i32) -> (i32, i32, i32) {
    %c0_i32 = arith.constant 0 : i32
    %c0_i32_0 = arith.constant 0 : i32
    %c0_i32_1 = arith.constant 0 : i32
    %c0_i32_2 = arith.constant 0 : i32
    return %c0_i32, %c0_i32_0, %c0_i32_1 : i32, i32, i32
  }
  func.func @transform_11(%arg0: i32) -> (i32, i32, i32) {
    %c0_i32 = arith.constant 0 : i32
    %c0_i32_0 = arith.constant 0 : i32
    %c0_i32_1 = arith.constant 0 : i32
    %c0_i32_2 = arith.constant 0 : i32
    return %c0_i32, %c0_i32_0, %c0_i32_1 : i32, i32, i32
  }
  func.func @transform_12(%arg0: i32) -> (i32, i32, i32) {
    %c0_i32 = arith.constant 0 : i32
    %c0_i32_0 = arith.constant 0 : i32
    %c0_i32_1 = arith.constant 0 : i32
    %c0_i32_2 = arith.constant 0 : i32
    return %c0_i32, %c0_i32_0, %c0_i32_1 : i32, i32, i32
  }
  func.func @transform_13(%arg0: i32) -> (i32, i32, i32) {
    %c0_i32 = arith.constant 0 : i32
    %c0_i32_0 = arith.constant 0 : i32
    %c0_i32_1 = arith.constant 0 : i32
    %c0_i32_2 = arith.constant 0 : i32
    return %c0_i32, %c0_i32_0, %c0_i32_1 : i32, i32, i32
  }
  func.func @transform_14(%arg0: i32) -> (i32, i32, i32) {
    %c0_i32 = arith.constant 0 : i32
    %c0_i32_0 = arith.constant 0 : i32
    %c0_i32_1 = arith.constant 0 : i32
    %c0_i32_2 = arith.constant 0 : i32
    return %c0_i32, %c0_i32_0, %c0_i32_1 : i32, i32, i32
  }
  func.func @transform_15(%arg0: i32) -> (i32, i32, i32) {
    %c0_i32 = arith.constant 0 : i32
    %c0_i32_0 = arith.constant 0 : i32
    %c0_i32_1 = arith.constant 0 : i32
    %c0_i32_2 = arith.constant 0 : i32
    return %c0_i32, %c0_i32_0, %c0_i32_1 : i32, i32, i32
  }
  func.func @transform_16(%arg0: i32) -> (i32, i32) {
    %c0_i32 = arith.constant 0 : i32
    %c0_i32_0 = arith.constant 0 : i32
    %c0_i32_1 = arith.constant 0 : i32
    return %c0_i32, %c0_i32_0 : i32, i32
  }
  func.func @transform_17(%arg0: i32) -> (i32, i32) {
    %c0_i32 = arith.constant 0 : i32
    %c0_i32_0 = arith.constant 0 : i32
    %c0_i32_1 = arith.constant 0 : i32
    return %c0_i32, %c0_i32_0 : i32, i32
  }
  func.func @transform_18(%arg0: i32) -> (i32, i32) {
    %c0_i32 = arith.constant 0 : i32
    %c0_i32_0 = arith.constant 0 : i32
    %c0_i32_1 = arith.constant 0 : i32
    return %c0_i32, %c0_i32_0 : i32, i32
  }
  func.func @transform_19(%arg0: i32) -> (i32, i32) {
    %c0_i32 = arith.constant 0 : i32
    %c0_i32_0 = arith.constant 0 : i32
    %c0_i32_1 = arith.constant 0 : i32
    return %c0_i32, %c0_i32_0 : i32, i32
  }
  func.func @transform_20(%arg0: i32) -> (i32, i32) {
    %c0_i32 = arith.constant 0 : i32
    %c0_i32_0 = arith.constant 0 : i32
    %c0_i32_1 = arith.constant 0 : i32
    return %c0_i32, %c0_i32_0 : i32, i32
  }
  func.func @transform_21(%arg0: i32) -> (i32, i32) {
    %c0_i32 = arith.constant 0 : i32
    %c0_i32_0 = arith.constant 0 : i32
    %c0_i32_1 = arith.constant 0 : i32
    return %c0_i32, %c0_i32_0 : i32, i32
  }
  func.func @transform_22(%arg0: i32) -> (i32, i32) {
    %c0_i32 = arith.constant 0 : i32
    %c0_i32_0 = arith.constant 0 : i32
    %c0_i32_1 = arith.constant 0 : i32
    return %c0_i32, %c0_i32_0 : i32, i32
  }
  func.func @transform_23(%arg0: i32) -> (i32, i32) {
    %c0_i32 = arith.constant 0 : i32
    %c0_i32_0 = arith.constant 0 : i32
    %c0_i32_1 = arith.constant 0 : i32
    return %c0_i32, %c0_i32_0 : i32, i32
  }
  func.func @transform_24(%arg0: i32) -> (i32, i32) {
    %c0_i32 = arith.constant 0 : i32
    %c0_i32_0 = arith.constant 0 : i32
    %c0_i32_1 = arith.constant 0 : i32
    return %c0_i32, %c0_i32_0 : i32, i32
  }
  func.func @transform_25(%arg0: i32) -> (i32, i32) {
    %c0_i32 = arith.constant 0 : i32
    %c0_i32_0 = arith.constant 0 : i32
    %c0_i32_1 = arith.constant 0 : i32
    return %c0_i32, %c0_i32_0 : i32, i32
  }
  func.func @transform_26(%arg0: i32) -> (i32, i32) {
    %c0_i32 = arith.constant 0 : i32
    %c0_i32_0 = arith.constant 0 : i32
    %c0_i32_1 = arith.constant 0 : i32
    return %c0_i32, %c0_i32_0 : i32, i32
  }
  func.func @transform_27(%arg0: i32) -> (i32, i32) {
    %c0_i32 = arith.constant 0 : i32
    %c0_i32_0 = arith.constant 0 : i32
    %c0_i32_1 = arith.constant 0 : i32
    return %c0_i32, %c0_i32_0 : i32, i32
  }
  func.func @transform_28(%arg0: i32) -> (i32, i32) {
    %c0_i32 = arith.constant 0 : i32
    %c0_i32_0 = arith.constant 0 : i32
    %c0_i32_1 = arith.constant 0 : i32
    return %c0_i32, %c0_i32_0 : i32, i32
  }
  func.func @transform_29(%arg0: i32) -> (i32, i32) {
    %c0_i32 = arith.constant 0 : i32
    %c0_i32_0 = arith.constant 0 : i32
    %c0_i32_1 = arith.constant 0 : i32
    return %c0_i32, %c0_i32_0 : i32, i32
  }
  func.func @transform_30(%arg0: i32) -> (i32, i32) {
    %c0_i32 = arith.constant 0 : i32
    %c0_i32_0 = arith.constant 0 : i32
    %c0_i32_1 = arith.constant 0 : i32
    return %c0_i32, %c0_i32_0 : i32, i32
  }
  func.func @transform_31(%arg0: i32) -> (i32, i32) {
    %c0_i32 = arith.constant 0 : i32
    %c0_i32_0 = arith.constant 0 : i32
    %c0_i32_1 = arith.constant 0 : i32
    return %c0_i32, %c0_i32_0 : i32, i32
  }
  func.func @transform_32(%arg0: i32) -> (i32, i32, i32) {
    %c0_i32 = arith.constant 0 : i32
    %c0_i32_0 = arith.constant 0 : i32
    %c0_i32_1 = arith.constant 0 : i32
    return %arg0, %c0_i32, %c0_i32_0 : i32, i32, i32
  }
}

</mosaic_0001>

<bundles_post_ra>
// kernel: tpu_custom_call.1
= control target key start
LH: loop header
LB: loop body
LE: loop exit
PB: predicated region body
PF: predicated region fallthrough
CT: control target
= control target key end

     0   :  { %s2159_s6 = smov 1   ;;  %s2160_s10 = smov 2   ;;  %s2921_s0 = inlined_call_operand.smem [shape: u32[33], index: -1, kind: input, shape index: {}] }
   0x1   :  { %s2201_s5 = sld [smem:[%s2921_s0]]   ;;  %s2161_s14 = smov 3  }
   0x2   :  { %s2206_s9 = sld [smem:[%s2921_s0 + %s2159_s6]]   ;;  %s2162_s18 = smov 4  }
   0x3   :  { %s2211_s13 = sld [smem:[%s2921_s0 + %s2160_s10]]   ;;  %s2163_s22 = smov 5  }
   0x4   :  { %s2216_s17 = sld [smem:[%s2921_s0 + %s2161_s14]]   ;;  %s2164_s26 = smov 6  }
   0x5   :  { %s2221_s21 = sld [smem:[%s2921_s0 + %s2162_s18]]   ;;  %s2165_s30 = smov 7  }
   0x6   :  { %s2226_s25 = sld [smem:[%s2921_s0 + %s2163_s22]]   ;;  %s2166_s4 = smov 8  }
   0x7   :  { %2926 = sst [smem:[#allocation6_spill]] %s2201_s5  ;;  %s2167_s10 = smov 9  }
   0x8   :  { %2927 = sst [smem:[#allocation7_spill]] %s2206_s9  ;;  %s2168_s15 = smov 10  }
   0x9   :  { %s2231_s29 = sld [smem:[%s2921_s0 + %s2164_s26]]   ;;  %s2169_s20 = smov 11  }
   0xa   :  { %s2236_s3 = sld [smem:[%s2921_s0 + %s2165_s30]]   ;;  %s2170_s26 = smov 12  }
   0xb   :  { %s2241_s8 = sld [smem:[%s2921_s0 + %s2166_s4]]   ;;  %s2171_s1 = smov 13  }
   0xc   :  { %2928 = sst [smem:[#allocation8_spill]] %s2226_s25  ;;  %s2172_s7 = smov 14  }
   0xd   :  { %s2246_s14 = sld [smem:[%s2921_s0 + %s2167_s10]]   ;;  %s2174_s22 = smov 16  }
   0xe   :  { %s2251_s19 = sld [smem:[%s2921_s0 + %s2168_s15]]   ;;  %s2173_s15 = smov 15  }
   0xf   :  { %2929 = sst [smem:[#allocation9_spill]] %s2231_s29  ;;  %s2175_s28 = smov 17  }
  0x10   :  { %s2256_s24 = sld [smem:[%s2921_s0 + %s2169_s20]]   ;;  %s2190_s23 = smov 32  }
  0x11   :  { %s2261_s30 = sld [smem:[%s2921_s0 + %s2170_s26]]  }
  0x12   :  { %s2266_s6 = sld [smem:[%s2921_s0 + %s2171_s1]]  }
  0x13   :  { %s2271_s12 = sld [smem:[%s2921_s0 + %s2172_s7]]   ;;  %s2176_s7 = smov 18  }
  0x14   :  { %s2276_s20 = sld [smem:[%s2921_s0 + %s2173_s15]]   ;;  %s2177_s15 = smov 19  }
  0x15   :  { %s2281_s27 = sld [smem:[%s2921_s0 + %s2174_s22]]   ;;  %s2178_s22 = smov 20  }
  0x16   :  { %s2286_s4 = sld [smem:[%s2921_s0 + %s2175_s28]]   ;;  %s2179_s28 = smov 21  }
  0x17   :  { %s2291_s29 = sld [smem:[%s2921_s0 + %s2176_s7]]   ;;  %s2180_s7 = smov 22  }
  0x18   :  { %s2296_s25 = sld [smem:[%s2921_s0 + %s2177_s15]]   ;;  %s2181_s15 = smov 23  }
  0x19   :  { %s2301_s9 = sld [smem:[%s2921_s0 + %s2178_s22]]   ;;  %s2182_s22 = smov 24  }
  0x1a   :  { %s2306_s5 = sld [smem:[%s2921_s0 + %s2179_s28]]   ;;  %s2183_s28 = smov 25  }
  0x1d   :  { %2930 = sst [smem:[#allocation10_spill]] %s2291_s29 }
  0x1e   :  { %2931 = sst [smem:[#allocation11_spill]] %s2296_s25 }
  0x1f   :  { %2932 = sst [smem:[#allocation12_spill]] %s2301_s9 }
  0x20   :  { %2933 = sst [smem:[#allocation13_spill]] %s2306_s5 }
  0x21   :  { %s2311_s29 = sld [smem:[%s2921_s0 + %s2180_s7]]   ;;  %s2184_s7 = smov 26  }
  0x22   :  { %s2316_s25 = sld [smem:[%s2921_s0 + %s2181_s15]]   ;;  %s2185_s15 = smov 27  }
  0x23   :  { %s2321_s9 = sld [smem:[%s2921_s0 + %s2182_s22]]   ;;  %s2186_s22 = smov 28  }
  0x24   :  { %s2326_s5 = sld [smem:[%s2921_s0 + %s2183_s28]]   ;;  %s2187_s28 = smov 29  }
  0x27   :  { %2934 = sst [smem:[#allocation14_spill]] %s2311_s29 }
  0x28   :  { %2935 = sst [smem:[#allocation15_spill]] %s2316_s25 }
  0x29   :  { %2936 = sst [smem:[#allocation16_spill]] %s2321_s9 }
  0x2a   :  { %2937 = sst [smem:[#allocation17_spill]] %s2326_s5 }
  0x2b   :  { %s2331_s29 = sld [smem:[%s2921_s0 + %s2184_s7]]   ;;  %s2188_s7 = smov 30  }
  0x2c   :  { %s2336_s25 = sld [smem:[%s2921_s0 + %s2185_s15]]   ;;  %s2189_s15 = smov 31  }
  0x2d   :  { %s2341_s9 = sld [smem:[%s2921_s0 + %s2186_s22]]  }
  0x2e   :  { %s2346_s5 = sld [smem:[%s2921_s0 + %s2187_s28]]  }
  0x31   :  { %2938 = sst [smem:[#allocation18_spill]] %s2331_s29 }
  0x32   :  { %2939 = sst [smem:[#allocation19_spill]] %s2336_s25 }
  0x33   :  { %2940 = sst [smem:[#allocation20_spill]] %s2341_s9 }
  0x34   :  { %s2351_s29 = sld [smem:[%s2921_s0 + %s2188_s7]]  }
  0x35   :  { %s1854_s25 = sld [smem:[%s2921_s0 + %s2189_s15]]  }
  0x36   :  { %s2359_s9 = sld [smem:[%s2921_s0 + %s2190_s23]]  }
  0x3b   :  { %v70_v0 = vstv %s1854_s25 }
  0x3c   :  { %71 = vst [vmem:[#allocation2] sm:$0x1] %v70_v0 }
  0x3d   :  { %vm143_vm0 = vcmask 523264   ;;  %v2362_v1 = vld [vmem:[%s2216_s17 + $0x8] sm:$0xff]  ;;  %v2365_v2 = vld [vmem:[%s2216_s17] sm:$0xff] }
  0x3e   :  { %v2368_v3 = vld [vmem:[%s2211_s13] sm:$0xff]  ;;  %v271_v4 = vsel %vm143_vm0, %v2362_v1, 0.0  ;;  %v268_v5 = vsel %vm143_vm0, %v2365_v2, 0.0  ;;  %v277_v7 = vmul.f32 %v2362_v1, %v2362_v1  ;;  %v276_v8 = vmul.f32 %v2365_v2, %v2365_v2  ;;  %v2386_v13 = vld [vmem:[%s2211_s13 + $0x8] sm:$0xff] }
  0x3f   :  { %v262_v6 = vsel %vm143_vm0, %v2368_v3, 0.0  ;;  %272 = vadd.xlane.f32.xlu1 %v271_v4  ;;  %269 = vadd.xlane.f32.xlu0 %v268_v5  ;;  %v274_v9 = vmul.f32 %v2368_v3, %v2368_v3 }
  0x40   :  { %263 = vadd.xlane.f32.xlu2 %v262_v6  ;;  %v287_v10 = vsel %vm143_vm0, %v277_v7, 0.0  ;;  %v284_v11 = vsel %vm143_vm0, %v276_v8, 0.0 }
  0x41   :  { %v278_v12 = vsel %vm143_vm0, %v274_v9, 0.0 }
  0x47   :  { %288 = vadd.xlane.f32.xlu1 %v287_v10  ;;  %285 = vadd.xlane.f32.xlu0 %v284_v11 }
  0x48   :  { %72 = vsyncpa [#allocation4], 0  ;;  %279 = vadd.xlane.f32.xlu2 %v278_v12  ;;  %v275_v14 = vmul.f32 %v2386_v13, %v2386_v13  ;;  %v265_v15 = vsel %vm143_vm0, %v2386_v13, 0.0  ;;  %v381_v17 = vld [vmem:[%s2246_s14 + $0x38] sm:$0xff]  ;;  %v380_v20 = vld [vmem:[%s2246_s14 + $0x30] sm:$0xff]  ;;  %vm491_vm13 = vcmask 130048  }
  0x49   :  { %v422_v18 = vld [vmem:[%s2256_s24 + $0x38] sm:$0xff]  ;;  %400 = vmatpush.msra.mxu0 %v381_v17  ;;  %v421_v21 = vld [vmem:[%s2256_s24 + $0x30] sm:$0xff]  ;;  %v379_v23 = vld [vmem:[%s2246_s14 + $0x28] sm:$0xff]  ;;  %s2941_s0 = sld [smem:[#allocation10_spill]]  ;;  %s2149_s2 = scalar_lea.hbm %s2359_s9, 1 }
  0x4a   :  { %v281_v16 = vsel %vm143_vm0, %v275_v14, 0.0  ;;  %v463_v19 = vld [vmem:[%s2266_s6 + $0x38] sm:$0xff]  ;;  %441 = vmatpush.msra.mxu1 %v422_v18  ;;  %v462_v22 = vld [vmem:[%s2266_s6 + $0x30] sm:$0xff]  ;;  %v420_v24 = vld [vmem:[%s2256_s24 + $0x28] sm:$0xff]  ;;  %s2942_s13 = sld [smem:[#allocation13_spill]] }
  0x4b   :  { %476 = vmatpush.msra.mxu2 %v463_v19  ;;  %401 = vmatpush.msra.mxu0 %v380_v20  ;;  %v461_v25 = vld [vmem:[%s2266_s6 + $0x28] sm:$0xff]  ;;  %v378_v26 = vld [vmem:[%s2246_s14 + $0x20] sm:$0xff]  ;;  %v377_v32 = vld [vmem:[%s2246_s14 + $0x18] sm:$0xff]  ;;  %s2943_s17 = sld [smem:[#allocation11_spill]] }
  0x4c   :  { %442 = vmatpush.msra.mxu1 %v421_v21  ;;  %v419_v27 = vld [vmem:[%s2256_s24 + $0x20] sm:$0xff]  ;;  %v418_v33 = vld [vmem:[%s2256_s24 + $0x18] sm:$0xff]  ;;  %v376_v36 = vld [vmem:[%s2246_s14 + $0x10] sm:$0xff]  ;;  %s2945_s25 = sld [smem:[#allocation14_spill]] }
  0x4d   :  { %477 = vmatpush.msra.mxu2 %v462_v22  ;;  %402 = vmatpush.msra.mxu0 %v379_v23  ;;  %v460_v28 = vld [vmem:[%s2266_s6 + $0x20] sm:$0xff]  ;;  %v459_v34 = vld [vmem:[%s2266_s6 + $0x18] sm:$0xff]  ;;  %v417_v37 = vld [vmem:[%s2256_s24 + $0x10] sm:$0xff] }
  0x4e   :  { %443 = vmatpush.msra.mxu1 %v420_v24  ;;  %v458_v38 = vld [vmem:[%s2266_s6 + $0x10] sm:$0xff]  ;;  %v375_v41 = vld [vmem:[%s2246_s14 + $0x8] sm:$0xff]  ;;  %v374_v45 = vld [vmem:[%s2246_s14] sm:$0xff] }
  0x4f   :  { %266 = vadd.xlane.f32.xlu0 %v265_v15  ;;  %282 = vadd.xlane.f32.xlu1 %v281_v16  ;;  %v416_v42 = vld [vmem:[%s2256_s24 + $0x8] sm:$0xff]  ;;  %v415_v46 = vld [vmem:[%s2256_s24] sm:$0xff]  ;;  %v1886_v55 = vld [vmem:[%s2256_s24 + $0x78] sm:$0xff] }
  0x50   :  { %478 = vmatpush.msra.mxu2 %v461_v25  ;;  %403 = vmatpush.msra.mxu0 %v378_v26  ;;  %v457_v43 = vld [vmem:[%s2266_s6 + $0x8] sm:$0xff]  ;;  %v456_v47 = vld [vmem:[%s2266_s6] sm:$0xff]  ;;  %v1897_v56 = vld [vmem:[%s2266_s6 + $0x78] sm:$0xff] }
  0x51   :  { %444 = vmatpush.msra.mxu1 %v419_v27  ;;  %v1875_v58 = vld [vmem:[%s2246_s14 + $0x78] sm:$0xff]  ;;  %v1885_v59 = vld [vmem:[%s2256_s24 + $0x70] sm:$0xff]  ;;  %v1884_v0 = vld [vmem:[%s2256_s24 + $0x68] sm:$0xff] }
  0x52   :  { %479 = vmatpush.msra.mxu2 %v460_v28  ;;  %404 = vmatpush.msra.mxu0 %v377_v32  ;;  %v1896_v60 = vld [vmem:[%s2266_s6 + $0x70] sm:$0xff]  ;;  %v1895_v4 = vld [vmem:[%s2266_s6 + $0x68] sm:$0xff]  ;;  %v1883_v9 = vld [vmem:[%s2256_s24 + $0x60] sm:$0xff] }
  0x53   :  { %445 = vmatpush.msra.mxu1 %v418_v33  ;;  %v1874_v63 = vld [vmem:[%s2246_s14 + $0x70] sm:$0xff]  ;;  %v1873_v6 = vld [vmem:[%s2246_s14 + $0x68] sm:$0xff]  ;;  %v1894_v10 = vld [vmem:[%s2266_s6 + $0x60] sm:$0xff] }
  0x54   :  { %480 = vmatpush.msra.mxu2 %v459_v34  ;;  %405 = vmatpush.msra.mxu0 %v376_v36  ;;  %v1872_v15 = vld [vmem:[%s2246_s14 + $0x60] sm:$0xff]  ;;  %v1882_v16 = vld [vmem:[%s2256_s24 + $0x58] sm:$0xff]  ;;  %v1881_v21 = vld [vmem:[%s2256_s24 + $0x50] sm:$0xff] }
  0x55   :  { %446 = vmatpush.msra.mxu1 %v417_v37  ;;  %v1893_v17 = vld [vmem:[%s2266_s6 + $0x58] sm:$0xff]  ;;  %v1892_v22 = vld [vmem:[%s2266_s6 + $0x50] sm:$0xff]  ;;  %v1880_v25 = vld [vmem:[%s2256_s24 + $0x48] sm:$0xff] }
  0x56   :  { %481 = vmatpush.msra.mxu2 %v458_v38  ;;  %406 = vmatpush.msra.mxu0 %v375_v41  ;;  %v1871_v20 = vld [vmem:[%s2246_s14 + $0x58] sm:$0xff]  ;;  %v1870_v23 = vld [vmem:[%s2246_s14 + $0x50] sm:$0xff]  ;;  %v1891_v26 = vld [vmem:[%s2266_s6 + $0x48] sm:$0xff] }
  0x57   :  { %447 = vmatpush.msra.mxu1 %v416_v42  ;;  %v1869_v27 = vld [vmem:[%s2246_s14 + $0x48] sm:$0xff]  ;;  %v1868_v42 = vld [vmem:[%s2246_s14 + $0x40] sm:$0xff] }
  0x58   :  { %482 = vmatpush.msra.mxu2 %v457_v43  ;;  %407 = vmatpush.msra.mxu0 %v374_v45 }
  0x59   :  { %448 = vmatpush.msra.mxu1 %v415_v46 }
  0x5a   :  { %483 = vmatpush.msra.mxu2 %v456_v47  ;;  %606 = vmatpush.msrb.mxu0 %v1875_v58 }
  0x5b   :  { %643 = vmatpush.msrb.mxu1 %v1886_v55  ;;  %v2046_v55 = vld [vmem:[%s2236_s3] ss:$0 sm:$0xff]  ;;  %s2946_s3 = sld [smem:[#allocation17_spill]] }
  0x5c   :  { %680 = vmatpush.msrb.mxu2 %v1897_v56  ;;  %607 = vmatpush.msrb.mxu0 %v1874_v63  ;;  %v2047_v63 = vld [vmem:[%s2241_s8] ss:$0 sm:$0xff]  ;;  %s2947_s8 = sld [smem:[#allocation15_spill]] }
  0x5d   :  { %644 = vmatpush.msrb.mxu1 %v1885_v59 }
  0x5e   :  { %681 = vmatpush.msrb.mxu2 %v1896_v60  ;;  %608 = vmatpush.msrb.mxu0 %v1873_v6 }
  0x5f   :  { %645 = vmatpush.msrb.mxu1 %v1884_v0 }
  0x60   :  { %682 = vmatpush.msrb.mxu2 %v1895_v4  ;;  %609 = vmatpush.msrb.mxu0 %v1872_v15 }
  0x61   :  { %646 = vmatpush.msrb.mxu1 %v1883_v9 }
  0x62   :  { %683 = vmatpush.msrb.mxu2 %v1894_v10  ;;  %610 = vmatpush.msrb.mxu0 %v1871_v20  ;;  %v2048_v20 = vld [vmem:[%s2251_s19] ss:$0 sm:$0xff] }
  0x63   :  { %647 = vmatpush.msrb.mxu1 %v1882_v16 }
  0x64   :  { %684 = vmatpush.msrb.mxu2 %v1893_v17  ;;  %611 = vmatpush.msrb.mxu0 %v1870_v23  ;;  %v2049_v17 = vld [vmem:[%s2261_s30] ss:$0 sm:$0xff] }
  0x65   :  { %648 = vmatpush.msrb.mxu1 %v1881_v21  ;;  %v2050_v23 = vld [vmem:[%s2271_s12] ss:$0 sm:$0xff] }
  0x66   :  { %685 = vmatpush.msrb.mxu2 %v1892_v22  ;;  %612 = vmatpush.msrb.mxu0 %v1869_v27 }
  0x67   :  { %649 = vmatpush.msrb.mxu1 %v1880_v25 }
  0x68   :  { %686 = vmatpush.msrb.mxu2 %v1891_v26  ;;  %613 = vmatpush.msrb.mxu0 %v1868_v42 }
  0xb2   :  { %v273_v29 = vpop.xlane.xlu1 %272  ;;  %v270_v30 = vpop.xlane.xlu0 %269 }
  0xb3   :  { %v264_v31 = vpop.xlane.xlu2 %263  ;;  %v2408_v35 = vmul.f32 0.015625, %v273_v29  ;;  %v2415_v40 = vmul.f32 0.015625, %v270_v30  ;;  %v1879_v30 = vld [vmem:[%s2256_s24 + $0x40] sm:$0xff] }
  0xb4   :  { %v2413_v39 = vmul.f32 0.015625, %v264_v31  ;;  %v1890_v31 = vld [vmem:[%s2266_s6 + $0x40] sm:$0xff]  ;;  %650 = vmatpush.msrb.mxu1 %v1879_v30 }
  0xb5   :  { %v301_v44 = vmul.f32 %v2408_v35, %v2408_v35  ;;  %v300_v51 = vmul.f32 %v2415_v40, %v2415_v40  ;;  %687 = vmatpush.msrb.mxu2 %v1890_v31  ;;  %v2051_v31 = vld [vmem:[%s2261_s30 + $0x1] ss:$0 sm:$0xff] }
  0xb6   :  { %v298_v48 = vmul.f32 %v2413_v39, %v2413_v39  ;;  %v350_v58 = vsub.f32 %v2368_v3, %v2413_v39 }
  0xba   :  { %v289_v49 = vpop.xlane.xlu1 %288  ;;  %v286_v50 = vpop.xlane.xlu0 %285 }
  0xbb   :  { %v297_v52 = vmul.f32 0.015625, %v289_v49  ;;  %v296_v53 = vmul.f32 0.015625, %v286_v50  ;;  %v280_v54 = vpop.xlane.xlu2 %279 }
  0xbc   :  { %v294_v57 = vmul.f32 0.015625, %v280_v54  ;;  %v352_v54 = vsub.f32 %v2365_v2, %v2415_v40  ;;  %v353_v40 = vsub.f32 %v2362_v1, %v2408_v35 }
  0xbd   :  { %v305_v61 = vsub.f32 %v297_v52, %v301_v44  ;;  %v304_v62 = vsub.f32 %v296_v53, %v300_v51 }
  0xbe   :  { %v302_v5 = vsub.f32 %v294_v57, %v298_v48 }
  0xbf   :  { %v2438_v7 = vadd.f32 1e-05, %v305_v61  ;;  %v2440_v8 = vadd.f32 1e-05, %v304_v62 }
  0xc0   :  { %v2444_v11 = vadd.f32 1e-05, %v302_v5 }
  0xc1   :  { %2069 = vrsqrt.f32 %v2438_v7  ;;  %vm336_vm5 = vweird.f32 %v2440_v8  ;;  %vm346_vm7 = vweird.f32 %v2438_v7 }
  0xc2   :  { %2071 = vrsqrt.f32 %v2440_v8  ;;  %v267_v12 = vpop.xlane.xlu0 %266  ;;  %v283_v14 = vpop.xlane.xlu1 %282  ;;  %vm316_vm2 = vweird.f32 %v2444_v11 }
  0xc3   :  { %2073 = vrsqrt.f32 %v2444_v11  ;;  %v2452_v18 = vmul.f32 0.015625, %v267_v12  ;;  %v295_v19 = vmul.f32 0.015625, %v283_v14 }
  0xc5   :  { %v299_v24 = vmul.f32 %v2452_v18, %v2452_v18  ;;  %v351_v1 = vsub.f32 %v2386_v13, %v2452_v18 }
  0xc7   :  { %v2070_v28 = vpop.eup %2069  ;;  %v303_v29 = vsub.f32 %v295_v19, %v299_v24 }
  0xc8   :  { %v2072_v32 = vpop.eup %2071  ;;  %v341_v33 = vmul.f32 %v2070_v28, %v2438_v7  ;;  %vm347_vm4 = vweird.f32 %v2070_v28 }
  0xc9   :  { %v2074_v34 = vpop.eup %2073  ;;  %v331_v36 = vmul.f32 %v2072_v32, %v2440_v8  ;;  %v307_v37 = vadd.f32 1e-05, %v303_v29  ;;  %vm337_vm1 = vweird.f32 %v2072_v32  ;;  %vm348_vm9 = vmor %vm346_vm7, %vm347_vm4 }
  0xca   :  { %v342_v38 = vmul.f32 %v2070_v28, %v341_v33  ;;  %v311_v41 = vmul.f32 %v2074_v34, %v2444_v11  ;;  %vm317_vm3 = vweird.f32 %v2074_v34  ;;  %vm338_vm6 = vmor %vm336_vm5, %vm337_vm1 }
  0xcb   :  { %v332_v43 = vmul.f32 %v2072_v32, %v331_v36  ;;  %2075 = vrsqrt.f32 %v307_v37  ;;  %vm318_vm8 = vmor %vm316_vm2, %vm317_vm3  ;;  %vm326_vm10 = vweird.f32 %v307_v37 }
  0xcc   :  { %v343_v44 = vmul.f32 0.5, %v342_v38  ;;  %v312_v45 = vmul.f32 %v2074_v34, %v311_v41 }
  0xcd   :  { %v333_v46 = vmul.f32 0.5, %v332_v43 }
  0xce   :  { %v344_v47 = vsub.f32 1.5, %v343_v44  ;;  %v313_v48 = vmul.f32 0.5, %v312_v45  ;;  %v2528_v44 = vld [vmem:[%s2221_s21] sm:$0xff] }
  0xcf   :  { %v334_v49 = vsub.f32 1.5, %v333_v46 }
  0xd0   :  { %v314_v50 = vsub.f32 1.5, %v313_v48  ;;  %v345_v52 = vmul.f32 %v2070_v28, %v344_v47 }
  0xd1   :  { %v2076_v51 = vpop.eup %2075  ;;  %v335_v53 = vmul.f32 %v2072_v32, %v334_v49  ;;  %v2533_v49 = vld [vmem:[%s2221_s21 + $0x8] sm:$0xff]  ;;  %s2944_s21 = sld [smem:[#allocation12_spill]] }
  0xd2   :  { %v315_v56 = vmul.f32 %v2074_v34, %v314_v50  ;;  %v321_v57 = vmul.f32 %v2076_v51, %v307_v37  ;;  %v349_v0 = vsel %vm348_vm9, %v2070_v28, %v345_v52  ;;  %vm327_vm11 = vweird.f32 %v2076_v51  ;;  %v2053_v37 = vld [vmem:[%s2271_s12 + $0x1] ss:$0 sm:$0xff] }
  0xd3   :  { %v339_v59 = vsel %vm338_vm6, %v2072_v32, %v335_v53  ;;  %v357_v39 = vmul.f32 %v353_v40, %v349_v0  ;;  %vm328_vm12 = vmor %vm326_vm10, %vm327_vm11 }
  0xd4   :  { %v356_v60 = vmul.f32 %v352_v54, %v339_v59  ;;  %v319_v61 = vsel %vm318_vm8, %v2074_v34, %v315_v56  ;;  %v322_v62 = vmul.f32 %v2076_v51, %v321_v57 }
  0xd5   :  { %v354_v2 = vmul.f32 %v350_v58, %v319_v61  ;;  %v364_v35 = vmul.f32 %v2046_v55, %v357_v39  ;;  %v1917_v39 = vld [vmem:[%s2246_s14 + $0xa0] sm:$0xff] }
  0xd6   :  { %v363_v4 = vmul.f32 %v2046_v55, %v356_v60  ;;  %v323_v5 = vmul.f32 0.5, %v322_v62 }
  0xd7   :  { %v361_v3 = vmul.f32 %v2046_v55, %v354_v2  ;;  %v2494_v14 = vadd.f32 %v2047_v63, %v364_v35  ;;  %v1915_v35 = vld [vmem:[%s2246_s14 + $0x90] sm:$0xff] }
  0xd8   :  { %v324_v6 = vsub.f32 1.5, %v323_v5  ;;  %v2482_v7 = vadd.f32 %v2047_v63, %v363_v4  ;;  %v1920_v4 = vld [vmem:[%s2246_s14 + $0xb8] sm:$0xff]  ;;  %v1919_v5 = vld [vmem:[%s2246_s14 + $0xb0] sm:$0xff] }
  0xd9   :  { %v2484_v8 = vadd.f32 %v2047_v63, %v361_v3  ;;  %v1918_v3 = vld [vmem:[%s2246_s14 + $0xa8] sm:$0xff] }
  0xda   :  { %v325_v9 = vmul.f32 %v2076_v51, %v324_v6  ;;  %1858 = vmatmul.msk.f32.vlgmr.msra.gmra.mxu1 %vm143_vm0, %v2482_v7  ;;  %1860 = vmatmul.msk.f32.vlgmr.msra.gmra.mxu2 %vm143_vm0, %v2482_v7 }
  0xdb   :  { %1856 = vmatmul.msk.f32.vlgmr.msra.gmra.mxu0 %vm143_vm0, %v2484_v8 }
  0xdc   :  { %v329_v10 = vsel %vm328_vm12, %v2076_v51, %v325_v9 }
  0xdd   :  { %v355_v11 = vmul.f32 %v351_v1, %v329_v10  ;;  %v1916_v1 = vld [vmem:[%s2246_s14 + $0x98] sm:$0xff]  ;;  %v583_v10 = vld [vmem:[%s2276_s20 + $0x8] sm:$0xff] }
  0xde   :  { %837 = vmatpush.msra.mxu2 %v583_v10  ;;  %v1959_v10 = vld [vmem:[%s2246_s14 + $0xd8] sm:$0xff] }
  0xdf   :  { %v362_v12 = vmul.f32 %v2046_v55, %v355_v11 }
  0xe1   :  { %v2496_v15 = vadd.f32 %v2047_v63, %v362_v12  ;;  %v2052_v12 = vld [vmem:[%s2251_s19 + $0x1] ss:$0 sm:$0xff] }
  0xe2   :  { %1859 = vmatmul.msk.f32.gmra.mxu1 %vm143_vm0, %v2494_v14  ;;  %1861 = vmatmul.msk.f32.gmra.mxu2 %vm143_vm0, %v2494_v14 }
  0xe3   :  { %1857 = vmatmul.msk.f32.gmra.mxu0 %vm143_vm0, %v2496_v15 }
  0xea   :  { %1888 = vmatmul.msk.f32.vlgmr.msrb.gmra.mxu1 %vm143_vm0, %v2482_v7  ;;  %1899 = vmatmul.msk.f32.vlgmr.msrb.gmra.mxu2 %vm143_vm0, %v2482_v7 }
  0xeb   :  { %1877 = vmatmul.msk.f32.vlgmr.msrb.gmra.mxu0 %vm143_vm0, %v2484_v8 }
  0xf2   :  { %1889 = vmatmul.msk.f32.gmra.mxu1 %vm143_vm0, %v2494_v14  ;;  %1900 = vmatmul.msk.f32.gmra.mxu2 %vm143_vm0, %v2494_v14 }
  0xf3   :  { %1878 = vmatmul.msk.f32.gmra.mxu0 %vm143_vm0, %v2496_v15 }
 0x157   :  { %v450_v13 = vpop.f32.mrf.mxu1 }
 0x158   :  { %v409_v21 = vpop.f32.mrf.mxu0  ;;  %v451_v22 = vadd.f32 %v2049_v17, %v450_v13  ;;  %v1914_v13 = vld [vmem:[%s2246_s14 + $0x88] sm:$0xff] }
 0x159   :  { %v410_v26 = vadd.f32 %v2048_v20, %v409_v21 }
 0x15d   :  { %v485_v16 = vpop.f32.mrf.mxu2 }
 0x15e   :  { %v486_v28 = vadd.f32 %v2050_v23, %v485_v16  ;;  %v1913_v16 = vld [vmem:[%s2246_s14 + $0x80] sm:$0xff] }
 0x15f   :  { %v453_v18 = vpop.f32.mrf.mxu1 }
 0x160   :  { %v454_v19 = vadd.f32 %v2049_v17, %v453_v18  ;;  %v412_v29 = vpop.f32.mrf.mxu0 }
 0x161   :  { %v413_v32 = vadd.f32 %v2048_v20, %v412_v29  ;;  %v582_v20 = vld [vmem:[%s2276_s20] sm:$0xff] }
 0x162   :  { %1862 = vmatpush.xpose.msk.msra.mxu3 %vm491_vm13, %v454_v19  ;;  %838 = vmatpush.msra.mxu2 %v582_v20 }
 0x165   :  { %v488_v24 = vpop.f32.mrf.mxu2 }
 0x166   :  { %v489_v25 = vadd.f32 %v2050_v23, %v488_v24  ;;  %1863 = vmatpush.xpose.msk.msra.mxu3 %vm491_vm13, %v451_v22 }
 0x167   :  { %v652_v27 = vpop.f32.mrf.mxu1 }
 0x168   :  { %v653_v36 = vadd.f32 %v2051_v31, %v652_v27  ;;  %v615_v11 = vpop.f32.mrf.mxu0 }
 0x169   :  { %1864 = vmatmul.msk.f32.vlgmr.msra.gmra.mxu3 %vm491_vm13, %v410_v26  ;;  %v616_v17 = vadd.f32 %v2052_v12, %v615_v11 }
 0x16a   :  { %573 = vmatpush.msrb.mxu3 %v489_v25 }
 0x16c   :  { %574 = vmatpush.msrb.mxu3 %v486_v28 }
 0x16d   :  { %v689_v30 = vpop.f32.mrf.mxu2 }
 0x16e   :  { %v690_v42 = vadd.f32 %v2053_v37, %v689_v30 }
 0x16f   :  { %v655_v33 = vpop.f32.mrf.mxu1 }
 0x170   :  { %v656_v34 = vadd.f32 %v2051_v31, %v655_v33  ;;  %v618_v18 = vpop.f32.mrf.mxu0 }
 0x171   :  { %1865 = vmatmul.msk.f32.gmra.mxu3 %vm491_vm13, %v413_v32  ;;  %v619_v19 = vadd.f32 %v2052_v12, %v618_v18  ;;  %v1958_v12 = vld [vmem:[%s2246_s14 + $0xd0] sm:$0xff]  ;;  %v2055_v18 = vld [vmem:[%s2261_s30 + $0x2] ss:$0 sm:$0xff] }
 0x172   :  { %1901 = vmatpush.xpose.msk.msra.mxu3 %vm491_vm13, %v656_v34 }
 0x175   :  { %v692_v38 = vpop.f32.mrf.mxu2 }
 0x176   :  { %v693_v41 = vadd.f32 %v2053_v37, %v692_v38  ;;  %1902 = vmatpush.xpose.msk.msra.mxu3 %vm491_vm13, %v653_v36 }
 0x178   :  { %776 = vmatpush.msra.mxu0 %v693_v41 }
 0x17a   :  { %777 = vmatpush.msra.mxu0 %v690_v42 }
 0x1ec   :  { %v521_v43 = vpop.f32.mrf.mxu3 }
 0x1ed   :  { %v527_v45 = vmul.f32 0.25, %v521_v43 }
 0x1ef   :  { %v529_v46 = vadd.f32 %v527_v45, %v2528_v44  ;;  %v1931_v45 = vld [vmem:[%s2256_s24 + $0xb8] sm:$0xff] }
 0x1f0   :  { %905 = vmatpush.msrb.mxu0 %v1931_v45  ;;  %v1953_v45 = vld [vmem:[%s2276_s20 + $0x28] sm:$0xff] }
 0x1f1   :  { %v531_v47 = vsel %vm491_vm13, %v529_v46, -inf }
 0x1f2   :  { %532 = vmax.xlane.f32.xlu2 %v531_v47  ;;  %v1929_v47 = vld [vmem:[%s2256_s24 + $0xa8] sm:$0xff] }
 0x1f4   :  { %v524_v48 = vpop.f32.mrf.mxu3 }
 0x1f5   :  { %v528_v50 = vmul.f32 0.25, %v524_v48  ;;  %v1928_v48 = vld [vmem:[%s2256_s24 + $0xa0] sm:$0xff] }
 0x1f7   :  { %v530_v51 = vadd.f32 %v528_v50, %v2533_v49  ;;  %v1927_v50 = vld [vmem:[%s2256_s24 + $0x98] sm:$0xff] }
 0x1f9   :  { %v534_v52 = vsel %vm491_vm13, %v530_v51, -inf }
 0x1fa   :  { %535 = vmax.xlane.f32.xlu0 %v534_v52  ;;  %v1925_v52 = vld [vmem:[%s2256_s24 + $0x88] sm:$0xff] }
 0x265   :  { %v533_v53 = vpop.xlane.xlu2 %532 }
 0x266   :  { %v537_v54 = vsub.f32 %v529_v46, %v533_v53  ;;  %v1930_v46 = vld [vmem:[%s2256_s24 + $0xb0] sm:$0xff]  ;;  %v1924_v53 = vld [vmem:[%s2256_s24 + $0x80] sm:$0xff] }
 0x267   :  { %906 = vmatpush.msrb.mxu0 %v1930_v46 }
 0x268   :  { %v539_v55 = vmul.f32 1.442695, %v537_v54 }
 0x269   :  { %907 = vmatpush.msrb.mxu0 %v1929_v47 }
 0x26a   :  { %2077 = vpow2.f32 %v539_v55  ;;  %v1908_v55 = vld [vmem:[%s2276_s20 + $0x18] sm:$0xff] }
 0x26b   :  { %908 = vmatpush.msrb.mxu0 %v1928_v48  ;;  %808 = vmatpush.msra.mxu1 %v1908_v55  ;;  %v1952_v48 = vld [vmem:[%s2276_s20 + $0x20] sm:$0xff] }
 0x26d   :  { %v536_v56 = vpop.xlane.xlu0 %535  ;;  %909 = vmatpush.msrb.mxu0 %v1927_v50 }
 0x26e   :  { %v538_v57 = vsub.f32 %v530_v51, %v536_v56  ;;  %v1926_v51 = vld [vmem:[%s2256_s24 + $0x90] sm:$0xff] }
 0x26f   :  { %910 = vmatpush.msrb.mxu0 %v1926_v51 }
 0x270   :  { %v2078_v58 = vpop.eup %2077  ;;  %v541_v59 = vmul.f32 1.442695, %v538_v57 }
 0x271   :  { %v543_v60 = vsel %vm491_vm13, %v2078_v58, 0.0  ;;  %911 = vmatpush.msrb.mxu0 %v1925_v52 }
 0x272   :  { %2079 = vpow2.f32 %v541_v59  ;;  %544 = vadd.xlane.f32.xlu1 %v543_v60 }
 0x273   :  { %912 = vmatpush.msrb.mxu0 %v1924_v53 }
 0x278   :  { %v2080_v61 = vpop.eup %2079 }
 0x279   :  { %v546_v62 = vsel %vm491_vm13, %v2080_v61, 0.0 }
 0x27a   :  { %547 = vadd.xlane.f32.xlu2 %v546_v62  ;;  %v1942_v62 = vld [vmem:[%s2266_s6 + $0xb8] sm:$0xff] }
 0x2e5   :  { %v545_v63 = vpop.xlane.xlu1 %544 }
 0x2e6   :  { %2081 = vrcp.f32 %v545_v63  ;;  %v1941_v63 = vld [vmem:[%s2266_s6 + $0xb0] sm:$0xff] }
 0x2ec   :  { %v2082_v0 = vpop.eup %2081 }
 0x2ed   :  { %v548_v2 = vpop.xlane.xlu2 %547  ;;  %v551_v40 = vmul.f32 %v2082_v0, %v2078_v58  ;;  %v1940_v0 = vld [vmem:[%s2266_s6 + $0xa8] sm:$0xff] }
 0x2ee   :  { %2083 = vrcp.f32 %v548_v2  ;;  %v1939_v2 = vld [vmem:[%s2266_s6 + $0xa0] sm:$0xff] }
 0x2ef   :  { %1866 = vmatmul.msk.f32.vlgmr.msrb.gmra.mxu3 %vm491_vm13, %v551_v40  ;;  %v1938_v40 = vld [vmem:[%s2266_s6 + $0x98] sm:$0xff] }
 0x2f0   :  { %868 = vmatpush.msrb.mxu3 %v1920_v4  ;;  %v1937_v4 = vld [vmem:[%s2266_s6 + $0x90] sm:$0xff] }
 0x2f2   :  { %869 = vmatpush.msrb.mxu3 %v1919_v5  ;;  %v1936_v5 = vld [vmem:[%s2266_s6 + $0x88] sm:$0xff] }
 0x2f4   :  { %v2084_v6 = vpop.eup %2083  ;;  %870 = vmatpush.msrb.mxu3 %v1918_v3  ;;  %v1935_v3 = vld [vmem:[%s2266_s6 + $0x80] sm:$0xff] }
 0x2f5   :  { %v552_v9 = vmul.f32 %v2084_v6, %v2080_v61  ;;  %v1907_v61 = vld [vmem:[%s2276_s20 + $0x10] sm:$0xff] }
 0x2f6   :  { %871 = vmatpush.msrb.mxu3 %v1917_v39  ;;  %809 = vmatpush.msra.mxu1 %v1907_v61  ;;  %v1963_v39 = vld [vmem:[%s2246_s14 + $0xf8] sm:$0xff] }
 0x2f7   :  { %1867 = vmatmul.msk.f32.gmra.mxu3 %vm491_vm13, %v552_v9  ;;  %v1962_v9 = vld [vmem:[%s2246_s14 + $0xf0] sm:$0xff] }
 0x2f8   :  { %872 = vmatpush.msrb.mxu3 %v1916_v1  ;;  %942 = vmatpush.msrb.mxu1 %v1942_v62  ;;  %v1961_v1 = vld [vmem:[%s2246_s14 + $0xe8] sm:$0xff] }
 0x2fa   :  { %873 = vmatpush.msrb.mxu3 %v1915_v35  ;;  %943 = vmatpush.msrb.mxu1 %v1941_v63  ;;  %v1960_v35 = vld [vmem:[%s2246_s14 + $0xe0] sm:$0xff] }
 0x2fc   :  { %874 = vmatpush.msrb.mxu3 %v1914_v13  ;;  %944 = vmatpush.msrb.mxu1 %v1940_v0  ;;  %v1957_v13 = vld [vmem:[%s2246_s14 + $0xc8] sm:$0xff] }
 0x2fe   :  { %875 = vmatpush.msrb.mxu3 %v1913_v16  ;;  %945 = vmatpush.msrb.mxu1 %v1939_v2  ;;  %v1956_v16 = vld [vmem:[%s2246_s14 + $0xc0] sm:$0xff]  ;;  %s2948_s14 = sld [smem:[#allocation16_spill]] }
 0x2ff   :  { %1903 = vmatmul.msk.f32.vlgmr.msra.gmra.mxu3 %vm491_vm13, %v616_v17 }
 0x300   :  { %946 = vmatpush.msrb.mxu1 %v1938_v40 }
 0x302   :  { %947 = vmatpush.msrb.mxu1 %v1937_v4 }
 0x304   :  { %948 = vmatpush.msrb.mxu1 %v1936_v5 }
 0x306   :  { %949 = vmatpush.msrb.mxu1 %v1935_v3 }
 0x307   :  { %1904 = vmatmul.msk.f32.gmra.mxu3 %vm491_vm13, %v619_v19 }
 0x30f   :  { %1922 = vmatmul.msk.f32.vlgmr.msrb.gmra.mxu3 %vm143_vm0, %v2484_v8 }
 0x317   :  { %1923 = vmatmul.msk.f32.gmra.mxu3 %vm143_vm0, %v2496_v15 }
 0x372   :  { %v576_v21 = vpop.f32.mrf.mxu3 }
 0x373   :  { %1911 = vmatmul.msk.f32.vlgmr.msra.gmra.mxu2 %vm491_vm13, %v576_v21 }
 0x37a   :  { %v579_v22 = vpop.f32.mrf.mxu3 }
 0x37b   :  { %1912 = vmatmul.msk.f32.gmra.mxu2 %vm491_vm13, %v579_v22  ;;  %v2054_v22 = vld [vmem:[%s2251_s19 + $0x2] ss:$0 sm:$0xff] }
 0x382   :  { %v724_v23 = vpop.f32.mrf.mxu3 }
 0x383   :  { %v730_v24 = vmul.f32 0.25, %v724_v23 }
 0x385   :  { %v732_v25 = vadd.f32 %v730_v24, %v2528_v44  ;;  %v1974_v24 = vld [vmem:[%s2256_s24 + $0xf8] sm:$0xff] }
 0x387   :  { %v734_v26 = vsel %vm491_vm13, %v732_v25, -inf }
 0x388   :  { %735 = vmax.xlane.f32.xlu0 %v734_v26  ;;  %v1973_v26 = vld [vmem:[%s2256_s24 + $0xf0] sm:$0xff] }
 0x38a   :  { %v727_v27 = vpop.f32.mrf.mxu3 }
 0x38b   :  { %v731_v28 = vmul.f32 0.25, %v727_v27  ;;  %v1972_v27 = vld [vmem:[%s2256_s24 + $0xe8] sm:$0xff] }
 0x38d   :  { %v733_v29 = vadd.f32 %v731_v28, %v2533_v49  ;;  %v1971_v28 = vld [vmem:[%s2256_s24 + $0xe0] sm:$0xff] }
 0x38f   :  { %v737_v30 = vsel %vm491_vm13, %v733_v29, -inf }
 0x390   :  { %738 = vmax.xlane.f32.xlu1 %v737_v30  ;;  %v1970_v30 = vld [vmem:[%s2256_s24 + $0xd8] sm:$0xff] }
 0x392   :  { %v877_v21 = vpop.f32.mrf.mxu3 }
 0x3fb   :  { %v736_v31 = vpop.xlane.xlu0 %735 }
 0x3fc   :  { %v740_v32 = vsub.f32 %v732_v25, %v736_v31  ;;  %v878_v25 = vadd.f32 %v2054_v22, %v877_v21 }
 0x3fe   :  { %v742_v33 = vmul.f32 1.442695, %v740_v32  ;;  %v1969_v32 = vld [vmem:[%s2256_s24 + $0xd0] sm:$0xff] }
 0x400   :  { %2085 = vpow2.f32 %v742_v33  ;;  %v1967_v33 = vld [vmem:[%s2256_s24 + $0xc0] sm:$0xff] }
 0x403   :  { %v739_v34 = vpop.xlane.xlu1 %738 }
 0x404   :  { %v741_v36 = vsub.f32 %v733_v29, %v739_v34  ;;  %v880_v29 = vpop.f32.mrf.mxu3  ;;  %v2626_v34 = vpop.f32.mrf.mxu2 }
 0x405   :  { %v881_v31 = vadd.f32 %v2054_v22, %v880_v29 }
 0x406   :  { %v2086_v37 = vpop.eup %2085  ;;  %v744_v38 = vmul.f32 1.442695, %v741_v36 }
 0x407   :  { %v746_v41 = vsel %vm491_vm13, %v2086_v37, 0.0 }
 0x408   :  { %2087 = vpow2.f32 %v744_v38  ;;  %747 = vadd.xlane.f32.xlu2 %v746_v41 }
 0x40c   :  { %v843_v36 = vpop.f32.mrf.mxu2 }
 0x40e   :  { %v2088_v42 = vpop.eup %2087 }
 0x40f   :  { %v749_v43 = vsel %vm491_vm13, %v2088_v42, 0.0 }
 0x410   :  { %750 = vadd.xlane.f32.xlu0 %v749_v43 }
 0x47b   :  { %v748_v54 = vpop.xlane.xlu2 %747 }
 0x47c   :  { %2089 = vrcp.f32 %v748_v54 }
 0x482   :  { %v2090_v56 = vpop.eup %2089 }
 0x483   :  { %v754_v57 = vmul.f32 %v2090_v56, %v2086_v37  ;;  %v751_v58 = vpop.xlane.xlu0 %750 }
 0x484   :  { %2091 = vrcp.f32 %v751_v58 }
 0x485   :  { %1905 = vmatmul.msk.f32.vlgmr.msra.gmra.mxu0 %vm491_vm13, %v754_v57 }
 0x486   :  { %1070 = vmatpush.msra.mxu0 %v1953_v45 }
 0x488   :  { %1071 = vmatpush.msra.mxu0 %v1952_v48 }
 0x48a   :  { %v2092_v59 = vpop.eup %2091 }
 0x48b   :  { %v755_v60 = vmul.f32 %v2092_v59, %v2088_v42  ;;  %v2056_v42 = vld [vmem:[%s2271_s12 + $0x2] ss:$0 sm:$0xff]  ;;  %v2058_v59 = vld [vmem:[%s2261_s30 + $0x3] ss:$0 sm:$0xff]  ;;  %s2951_s30 = sld [smem:[#allocation18_spill]] }
 0x48d   :  { %1906 = vmatmul.msk.f32.gmra.mxu0 %vm491_vm13, %v755_v60 }
 0x495   :  { %1933 = vmatmul.msk.f32.vlgmr.msrb.gmra.mxu0 %vm143_vm0, %v2482_v7 }
 0x49d   :  { %1934 = vmatmul.msk.f32.gmra.mxu0 %vm143_vm0, %v2494_v14 }
 0x502   :  { %v779_v6 = vpop.f32.mrf.mxu0 }
 0x503   :  { %1909 = vmatmul.msk.f32.vlgmr.msra.gmra.mxu1 %vm491_vm13, %v779_v6 }
 0x504   :  { %1103 = vmatpush.msra.mxu1 %v1963_v39 }
 0x506   :  { %1104 = vmatpush.msra.mxu1 %v1962_v9 }
 0x508   :  { %1105 = vmatpush.msra.mxu1 %v1961_v1  ;;  %v1985_v1 = vld [vmem:[%s2266_s6 + $0xf8] sm:$0xff] }
 0x50a   :  { %v782_v11 = vpop.f32.mrf.mxu0  ;;  %1106 = vmatpush.msra.mxu1 %v1960_v35  ;;  %v1984_v35 = vld [vmem:[%s2266_s6 + $0xf0] sm:$0xff] }
 0x50b   :  { %1910 = vmatmul.msk.f32.gmra.mxu1 %vm491_vm13, %v782_v11  ;;  %v1982_v11 = vld [vmem:[%s2266_s6 + $0xe0] sm:$0xff] }
 0x50c   :  { %1107 = vmatpush.msra.mxu1 %v1959_v10  ;;  %v1983_v10 = vld [vmem:[%s2266_s6 + $0xe8] sm:$0xff] }
 0x50e   :  { %1108 = vmatpush.msra.mxu1 %v1958_v12  ;;  %v1981_v12 = vld [vmem:[%s2266_s6 + $0xd8] sm:$0xff] }
 0x510   :  { %1109 = vmatpush.msra.mxu1 %v1957_v13  ;;  %v1980_v13 = vld [vmem:[%s2266_s6 + $0xd0] sm:$0xff] }
 0x512   :  { %v914_v17 = vpop.f32.mrf.mxu0  ;;  %1110 = vmatpush.msra.mxu1 %v1956_v16  ;;  %v1979_v16 = vld [vmem:[%s2266_s6 + $0xc8] sm:$0xff] }
 0x513   :  { %1944 = vmatmul.msk.f32.vlgmr.msrb.gmra.mxu1 %vm143_vm0, %v2482_v7  ;;  %v915_v23 = vadd.f32 %v2055_v18, %v914_v17  ;;  %v1978_v17 = vld [vmem:[%s2266_s6 + $0xc0] sm:$0xff]  ;;  %s2954_s6 = sld [smem:[#allocation19_spill]] }
 0x51a   :  { %v917_v19 = vpop.f32.mrf.mxu0 }
 0x51b   :  { %v918_v20 = vadd.f32 %v2055_v18, %v917_v19  ;;  %1945 = vmatmul.msk.f32.gmra.mxu1 %vm143_vm0, %v2494_v14 }
 0x51d   :  { %1946 = vmatpush.xpose.msk.msrb.mxu2 %vm491_vm13, %v918_v20 }
 0x521   :  { %1947 = vmatpush.xpose.msk.msrb.mxu2 %vm491_vm13, %v915_v23 }
 0x523   :  { %1965 = vmatmul.msk.f32.vlgmr.msra.gmra.mxu1 %vm143_vm0, %v2484_v8  ;;  %v1968_v8 = vld [vmem:[%s2256_s24 + $0xc8] sm:$0xff]  ;;  %s2950_s24 = sld [smem:[#allocation7_spill]] }
 0x524   :  { %1948 = vmatmul.msk.f32.vlgmr.msrb.gmra.mxu2 %vm491_vm13, %v878_v25 }
 0x525   :  { %1140 = vmatpush.msra.mxu2 %v1974_v24 }
 0x527   :  { %1141 = vmatpush.msra.mxu2 %v1973_v26 }
 0x529   :  { %1142 = vmatpush.msra.mxu2 %v1972_v27  ;;  %v2057_v27 = vld [vmem:[%s2251_s19 + $0x3] ss:$0 sm:$0xff]  ;;  %s2949_s19 = sld [smem:[#allocation6_spill]] }
 0x52b   :  { %1143 = vmatpush.msra.mxu2 %v1971_v28  ;;  %1966 = vmatmul.msk.f32.gmra.mxu1 %vm143_vm0, %v2496_v15 }
 0x52c   :  { %1949 = vmatmul.msk.f32.gmra.mxu2 %vm491_vm13, %v881_v31 }
 0x52d   :  { %1144 = vmatpush.msra.mxu2 %v1970_v30 }
 0x52f   :  { %1145 = vmatpush.msra.mxu2 %v1969_v32  ;;  %v2059_v32 = vld [vmem:[%s2271_s12 + $0x3] ss:$0 sm:$0xff]  ;;  %s2955_s12 = sld [smem:[#allocation20_spill]] }
 0x531   :  { %1146 = vmatpush.msra.mxu2 %v1968_v8 }
 0x533   :  { %1147 = vmatpush.msra.mxu2 %v1967_v33 }
 0x534   :  { %1976 = vmatmul.msk.f32.vlgmr.msra.gmra.mxu2 %vm143_vm0, %v2482_v7 }
 0x53c   :  { %1977 = vmatmul.msk.f32.gmra.mxu2 %vm143_vm0, %v2494_v14 }
 0x580   :  { %v2628_v15 = vpop.f32.mrf.mxu1 }
 0x581   :  { %v841_v33 = vadd.f32 %v2626_v34, %v2628_v15 }
 0x588   :  { %v814_v37 = vpop.f32.mrf.mxu1 }
 0x589   :  { %v2630_v38 = vadd.f32 %v843_v36, %v814_v37 }
 0x590   :  { %v951_v41 = vpop.f32.mrf.mxu1 }
 0x591   :  { %v952_v47 = vadd.f32 %v2056_v42, %v951_v41 }
 0x598   :  { %v954_v43 = vpop.f32.mrf.mxu1 }
 0x599   :  { %v955_v46 = vadd.f32 %v2056_v42, %v954_v43 }
 0x59b   :  { %1038 = vmatpush.msra.mxu3 %v955_v46 }
 0x59d   :  { %1039 = vmatpush.msra.mxu3 %v952_v47 }
 0x59f   :  { %1177 = vmatpush.msrb.mxu3 %v1985_v1  ;;  %v1331_v1 = vld [vmem:[%s2286_s4 + $0x48] sm:$0xff] }
 0x5a0   :  { %v1112_v26 = vpop.f32.mrf.mxu1 }
 0x5a1   :  { %1178 = vmatpush.msrb.mxu3 %v1984_v35  ;;  %v1113_v28 = vadd.f32 %v2057_v27, %v1112_v26  ;;  %v1328_v35 = vld [vmem:[%s2286_s4 + $0x30] sm:$0xff] }
 0x5a3   :  { %1179 = vmatpush.msrb.mxu3 %v1983_v10  ;;  %v1329_v10 = vld [vmem:[%s2286_s4 + $0x38] sm:$0xff] }
 0x5a5   :  { %1180 = vmatpush.msrb.mxu3 %v1982_v11 }
 0x5a7   :  { %v986_v50 = vpop.f32.mrf.mxu2  ;;  %1181 = vmatpush.msrb.mxu3 %v1981_v12 }
 0x5a8   :  { %v992_v51 = vmul.f32 0.25, %v986_v50  ;;  %v1115_v30 = vpop.f32.mrf.mxu1 }
 0x5a9   :  { %1182 = vmatpush.msrb.mxu3 %v1980_v13  ;;  %v1116_v31 = vadd.f32 %v2057_v27, %v1115_v30  ;;  %v1326_v13 = vld [vmem:[%s2286_s4 + $0x20] sm:$0xff] }
 0x5aa   :  { %v994_v52 = vadd.f32 %v992_v51, %v2528_v44 }
 0x5ab   :  { %1183 = vmatpush.msrb.mxu3 %v1979_v16  ;;  %v1327_v16 = vld [vmem:[%s2286_s4 + $0x28] sm:$0xff] }
 0x5ac   :  { %v996_v53 = vsel %vm491_vm13, %v994_v52, -inf }
 0x5ad   :  { %997 = vmax.xlane.f32.xlu1 %v996_v53  ;;  %1184 = vmatpush.msrb.mxu3 %v1978_v17  ;;  %v1324_v17 = vld [vmem:[%s2286_s4 + $0x10] sm:$0xff] }
 0x5af   :  { %v989_v54 = vpop.f32.mrf.mxu2 }
 0x5b0   :  { %v993_v55 = vmul.f32 0.25, %v989_v54 }
 0x5b2   :  { %v995_v56 = vadd.f32 %v993_v55, %v2533_v49 }
 0x5b4   :  { %v999_v57 = vsel %vm491_vm13, %v995_v56, -inf }
 0x5b5   :  { %1000 = vmax.xlane.f32.xlu2 %v999_v57 }
 0x5b7   :  { %v1149_v58 = vpop.f32.mrf.mxu2 }
 0x5b8   :  { %v1150_v62 = vadd.f32 %v2058_v59, %v1149_v58  ;;  %v1996_v58 = vld [vmem:[%s2276_s20 + $0x38] sm:$0xff] }
 0x5b9   :  { %1305 = vmatpush.msrb.mxu2 %v1996_v58  ;;  %v1485_v58 = vld [vmem:[%s2942_s13 + $0x58] sm:$0xff] }
 0x5bf   :  { %v1152_v60 = vpop.f32.mrf.mxu2 }
 0x5c0   :  { %v1153_v61 = vadd.f32 %v2058_v59, %v1152_v60 }
 0x5c2   :  { %1989 = vmatpush.xpose.msk.msrb.mxu0 %vm491_vm13, %v1153_v61 }
 0x5c6   :  { %1990 = vmatpush.xpose.msk.msrb.mxu0 %vm491_vm13, %v1150_v62 }
 0x620   :  { %v998_v63 = vpop.xlane.xlu1 %997 }
 0x621   :  { %v1002_v0 = vsub.f32 %v994_v52, %v998_v63 }
 0x623   :  { %v1004_v2 = vmul.f32 1.442695, %v1002_v0 }
 0x625   :  { %2093 = vpow2.f32 %v1004_v2  ;;  %v1995_v2 = vld [vmem:[%s2276_s20 + $0x30] sm:$0xff]  ;;  %s2956_s20 = sld [smem:[#allocation8_spill]] }
 0x626   :  { %1306 = vmatpush.msrb.mxu2 %v1995_v2  ;;  %v1498_v2 = vld [vmem:[%s2942_s13 + $0xc0] sm:$0xff] }
 0x628   :  { %v1001_v40 = vpop.xlane.xlu2 %1000 }
 0x629   :  { %v1003_v4 = vsub.f32 %v995_v56, %v1001_v40  ;;  %v1336_v40 = vld [vmem:[%s2286_s4 + $0x70] sm:$0xff] }
 0x62b   :  { %v2094_v5 = vpop.eup %2093  ;;  %v1006_v3 = vmul.f32 1.442695, %v1003_v4  ;;  %v1337_v4 = vld [vmem:[%s2286_s4 + $0x78] sm:$0xff] }
 0x62c   :  { %v1008_v39 = vsel %vm491_vm13, %v2094_v5, 0.0 }
 0x62d   :  { %2095 = vpow2.f32 %v1006_v3  ;;  %1009 = vadd.xlane.f32.xlu0 %v1008_v39  ;;  %v1335_v3 = vld [vmem:[%s2286_s4 + $0x68] sm:$0xff]  ;;  %v1332_v39 = vld [vmem:[%s2286_s4 + $0x50] sm:$0xff] }
 0x633   :  { %v2096_v6 = vpop.eup %2095 }
 0x634   :  { %v1011_v9 = vsel %vm491_vm13, %v2096_v6, 0.0 }
 0x635   :  { %1012 = vadd.xlane.f32.xlu1 %v1011_v9  ;;  %v1330_v9 = vld [vmem:[%s2286_s4 + $0x40] sm:$0xff] }
 0x6a0   :  { %v1010_v18 = vpop.xlane.xlu0 %1009 }
 0x6a1   :  { %2097 = vrcp.f32 %v1010_v18  ;;  %v1325_v18 = vld [vmem:[%s2286_s4 + $0x18] sm:$0xff] }
 0x6a7   :  { %v2098_v19 = vpop.eup %2097 }
 0x6a8   :  { %v1016_v20 = vmul.f32 %v2098_v19, %v2094_v5  ;;  %v1013_v21 = vpop.xlane.xlu1 %1012  ;;  %v1334_v5 = vld [vmem:[%s2286_s4 + $0x60] sm:$0xff] }
 0x6a9   :  { %2099 = vrcp.f32 %v1013_v21  ;;  %v1322_v19 = vld [vmem:[%s2286_s4] sm:$0xff] }
 0x6aa   :  { %1950 = vmatmul.msk.f32.vlgmr.msra.gmra.mxu3 %vm491_vm13, %v1016_v20  ;;  %v1323_v20 = vld [vmem:[%s2286_s4 + $0x8] sm:$0xff]  ;;  %v2060_v21 = vld [vmem:[%s2281_s27] ss:$0 sm:$0xff]  ;;  %s2957_s27 = sld [smem:[#allocation9_spill]] }
 0x6ab   :  { %1358 = vmatpush.msra.mxu3 %v1336_v40  ;;  %v1481_v40 = vld [vmem:[%s2942_s13 + $0x38] sm:$0xff] }
 0x6ad   :  { %1359 = vmatpush.msra.mxu3 %v1334_v5  ;;  %v1480_v5 = vld [vmem:[%s2942_s13 + $0x30] sm:$0xff] }
 0x6af   :  { %v2100_v22 = vpop.eup %2099  ;;  %1360 = vmatpush.msra.mxu3 %v1332_v39  ;;  %v1479_v39 = vld [vmem:[%s2942_s13 + $0x28] sm:$0xff] }
 0x6b0   :  { %v1017_v23 = vmul.f32 %v2100_v22, %v2096_v6  ;;  %v1333_v6 = vld [vmem:[%s2286_s4 + $0x58] sm:$0xff]  ;;  %s1815_s4 = sshll.u32 %s2359_s9, 4  ;;  %s1816_s4 = int_to_ptr.hbm [resolvable:$true] %s1815_s4 }
 0x6b1   :  { %1361 = vmatpush.msra.mxu3 %v1330_v9  ;;  %v1478_v9 = vld [vmem:[%s2942_s13 + $0x20] sm:$0xff]  ;;  %s2145_s28 = sshra.s32 %s1816_s4, 4  ;;  %s2146_s28 = int_to_ptr.hbm [resolvable:$true] %s2145_s28 }
 0x6b2   :  { %1951 = vmatmul.msk.f32.gmra.mxu3 %vm491_vm13, %v1017_v23  ;;  %s2147_s1 = scalar_lea.hbm %s2146_s28, 1  ;;  %p2150_p1 = scmp.lt.s32.totalorder %s2146_s28, %s2359_s9 }
 0x6b3   :  { %1362 = vmatpush.msra.mxu3 %v1328_v35  ;;  %v1477_v35 = vld [vmem:[%s2942_s13 + $0x18] sm:$0xff]  ;;  %p2148_p0 = scmp.ne.s32.totalorder %s2146_s28, %s2147_s1  ;;  %p2151_p2 = scmp.lt.s32.totalorder %s2149_s2, %s2147_s1 }
 0x6b5   :  { %1363 = vmatpush.msra.mxu3 %v1326_v13  ;;  %v1475_v13 = vld [vmem:[%s2942_s13 + $0x8] sm:$0xff]  ;;  %p2152_p3 = por %p2151_p2, %p2150_p1 }
 0x6b7   :  { %1364 = vmatpush.msra.mxu3 %v1324_v17  ;;  %v1474_v17 = vld [vmem:[%s2942_s13] sm:$0xff]  ;;  %p2153_p4 = pnand %p2152_p3, %p2148_p0 }
 0x6b9   :  { %1365 = vmatpush.msra.mxu3 %v1322_v19 }
 0x6ba   :  { %1987 = vmatmul.msk.f32.vlgmr.msrb.gmra.mxu3 %vm143_vm0, %v2482_v7 }
 0x6c2   :  { %1988 = vmatmul.msk.f32.gmra.mxu3 %vm143_vm0, %v2494_v14 }
 0x72d   :  { %v1041_v24 = vpop.f32.mrf.mxu3 }
 0x72e   :  { %1954 = vmatmul.msk.f32.vlgmr.msra.gmra.mxu0 %vm491_vm13, %v1041_v24 }
 0x72f   :  { %1381 = vmatpush.msra.mxu0 %v1337_v4  ;;  %v1497_v4 = vld [vmem:[%s2942_s13 + $0xb8] sm:$0xff] }
 0x731   :  { %1382 = vmatpush.msra.mxu0 %v1335_v3  ;;  %v1496_v3 = vld [vmem:[%s2942_s13 + $0xb0] sm:$0xff] }
 0x733   :  { %1383 = vmatpush.msra.mxu0 %v1333_v6  ;;  %v1495_v6 = vld [vmem:[%s2942_s13 + $0xa8] sm:$0xff] }
 0x735   :  { %v1044_v25 = vpop.f32.mrf.mxu3  ;;  %1384 = vmatpush.msra.mxu0 %v1331_v1  ;;  %v1494_v1 = vld [vmem:[%s2942_s13 + $0xa0] sm:$0xff] }
 0x736   :  { %1955 = vmatmul.msk.f32.gmra.mxu0 %vm491_vm13, %v1044_v25 }
 0x737   :  { %1385 = vmatpush.msra.mxu0 %v1329_v10  ;;  %v1493_v10 = vld [vmem:[%s2942_s13 + $0x98] sm:$0xff] }
 0x739   :  { %1386 = vmatpush.msra.mxu0 %v1327_v16  ;;  %v1491_v16 = vld [vmem:[%s2942_s13 + $0x88] sm:$0xff] }
 0x73b   :  { %1387 = vmatpush.msra.mxu0 %v1325_v18  ;;  %v1490_v18 = vld [vmem:[%s2942_s13 + $0x80] sm:$0xff] }
 0x73d   :  { %v1186_v29 = vpop.f32.mrf.mxu3  ;;  %1388 = vmatpush.msra.mxu0 %v1323_v20 }
 0x73e   :  { %1991 = vmatmul.msk.f32.vlgmr.msrb.gmra.mxu0 %vm491_vm13, %v1113_v28  ;;  %v1187_v14 = vadd.f32 %v2059_v32, %v1186_v29  ;;  %v1338_v28 = vld [vmem:[%s2941_s0] sm:$0x3] }
 0x73f   :  { %v1341_v29 = vperm.slane %v1338_v28, 1 }
 0x745   :  { %v1189_v8 = vpop.f32.mrf.mxu3 }
 0x746   :  { %v1190_v7 = vadd.f32 %v2059_v32, %v1189_v8  ;;  %1992 = vmatmul.msk.f32.gmra.mxu0 %vm491_vm13, %v1116_v31  ;;  %v1340_v32 = vperm.slane %v1338_v28, 0 }
 0x748   :  { %1273 = vmatpush.msrb.mxu1 %v1190_v7 }
 0x74a   :  { %1274 = vmatpush.msrb.mxu1 %v1187_v14 }
 0x7ab   :  { %v1073_v36 = vpop.f32.mrf.mxu0 }
 0x7ac   :  { %v2666_v37 = vadd.f32 %v1073_v36, %v841_v33 }
 0x7b3   :  { %v1076_v41 = vpop.f32.mrf.mxu0 }
 0x7b4   :  { %v2669_v42 = vadd.f32 %v1076_v41, %v2630_v38 }
 0x7bb   :  { %v1221_v43 = vpop.f32.mrf.mxu0 }
 0x7bc   :  { %v1227_v45 = vmul.f32 0.25, %v1221_v43 }
 0x7be   :  { %v1229_v46 = vadd.f32 %v1227_v45, %v2528_v44 }
 0x7c0   :  { %v1231_v47 = vsel %vm491_vm13, %v1229_v46, -inf }
 0x7c1   :  { %1232 = vmax.xlane.f32.xlu2 %v1231_v47 }
 0x7c3   :  { %v1224_v48 = vpop.f32.mrf.mxu0 }
 0x7c4   :  { %v1228_v50 = vmul.f32 0.25, %v1224_v48 }
 0x7c6   :  { %v1230_v51 = vadd.f32 %v1228_v50, %v2533_v49 }
 0x7c8   :  { %v1234_v34 = vsel %vm491_vm13, %v1230_v51, -inf }
 0x7c9   :  { %1235 = vmax.xlane.f32.xlu0 %v1234_v34 }
 0x834   :  { %v1233_v15 = vpop.xlane.xlu2 %1232 }
 0x835   :  { %v1237_v52 = vsub.f32 %v1229_v46, %v1233_v15 }
 0x837   :  { %v1239_v53 = vmul.f32 1.442695, %v1237_v52 }
 0x839   :  { %2101 = vpow2.f32 %v1239_v53  ;;  %v1489_v53 = vld [vmem:[%s2942_s13 + $0x78] sm:$0xff] }
 0x83a   :  { %1510 = vmatpush.msra.mxu1 %v1489_v53 }
 0x83c   :  { %v1236_v38 = vpop.xlane.xlu0 %1235 }
 0x83d   :  { %v1238_v54 = vsub.f32 %v1230_v51, %v1236_v38  ;;  %v1505_v38 = vld [vmem:[%s2942_s13 + $0xf8] sm:$0xff] }
 0x83e   :  { %1533 = vmatpush.msra.mxu2 %v1505_v38 }
 0x83f   :  { %v2102_v55 = vpop.eup %2101  ;;  %v1241_v56 = vmul.f32 1.442695, %v1238_v54  ;;  %v1488_v54 = vld [vmem:[%s2942_s13 + $0x70] sm:$0xff] }
 0x840   :  { %v1243_v44 = vsel %vm491_vm13, %v2102_v55, 0.0  ;;  %1511 = vmatpush.msra.mxu1 %v1488_v54 }
 0x841   :  { %2103 = vpow2.f32 %v1241_v56  ;;  %1244 = vadd.xlane.f32.xlu1 %v1243_v44  ;;  %v1487_v56 = vld [vmem:[%s2942_s13 + $0x68] sm:$0xff] }
 0x842   :  { %v1503_v44 = vld [vmem:[%s2942_s13 + $0xe8] sm:$0xff]  ;;  %1512 = vmatpush.msra.mxu1 %v1487_v56 }
 0x847   :  { %v2104_v57 = vpop.eup %2103 }
 0x848   :  { %v1246_v49 = vsel %vm491_vm13, %v2104_v57, 0.0 }
 0x849   :  { %1247 = vadd.xlane.f32.xlu2 %v1246_v49  ;;  %v1502_v49 = vld [vmem:[%s2942_s13 + $0xe0] sm:$0xff] }
 0x8b4   :  { %v1245_v59 = vpop.xlane.xlu1 %1244 }
 0x8b5   :  { %2105 = vrcp.f32 %v1245_v59  ;;  %v1501_v59 = vld [vmem:[%s2942_s13 + $0xd8] sm:$0xff] }
 0x8bb   :  { %v2106_v60 = vpop.eup %2105 }
 0x8bc   :  { %v1251_v61 = vmul.f32 %v2106_v60, %v2102_v55  ;;  %v1248_v62 = vpop.xlane.xlu2 %1247  ;;  %v1504_v55 = vld [vmem:[%s2942_s13 + $0xf0] sm:$0xff] }
 0x8bd   :  { %2107 = vrcp.f32 %v1248_v62  ;;  %1534 = vmatpush.msra.mxu2 %v1504_v55  ;;  %v1484_v60 = vld [vmem:[%s2942_s13 + $0x50] sm:$0xff]  ;;  %v1483_v62 = vld [vmem:[%s2942_s13 + $0x48] sm:$0xff] }
 0x8be   :  { %1993 = vmatmul.msk.f32.vlgmr.msrb.gmra.mxu1 %vm491_vm13, %v1251_v61  ;;  %v1500_v61 = vld [vmem:[%s2942_s13 + $0xd0] sm:$0xff] }
 0x8bf   :  { %1535 = vmatpush.msra.mxu2 %v1503_v44 }
 0x8c1   :  { %1536 = vmatpush.msra.mxu2 %v1502_v49 }
 0x8c3   :  { %v2108_v63 = vpop.eup %2107  ;;  %1537 = vmatpush.msra.mxu2 %v1501_v59 }
 0x8c4   :  { %v1252_v0 = vmul.f32 %v2108_v63, %v2104_v57  ;;  %v1486_v57 = vld [vmem:[%s2942_s13 + $0x60] sm:$0xff]  ;;  %v1499_v63 = vld [vmem:[%s2942_s13 + $0xc8] sm:$0xff] }
 0x8c5   :  { %1513 = vmatpush.msra.mxu1 %v1486_v57  ;;  %1538 = vmatpush.msra.mxu2 %v1500_v61 }
 0x8c6   :  { %1994 = vmatmul.msk.f32.gmra.mxu1 %vm491_vm13, %v1252_v0  ;;  %v1482_v0 = vld [vmem:[%s2942_s13 + $0x40] sm:$0xff] }
 0x8c7   :  { %1514 = vmatpush.msra.mxu1 %v1485_v58  ;;  %1539 = vmatpush.msra.mxu2 %v1499_v63 }
 0x8c9   :  { %1515 = vmatpush.msra.mxu1 %v1484_v60  ;;  %1540 = vmatpush.msra.mxu2 %v1498_v2 }
 0x8cb   :  { %1516 = vmatpush.msra.mxu1 %v1483_v62  ;;  %1541 = vmatpush.msra.mxu2 %v1497_v4 }
 0x8cd   :  { %1517 = vmatpush.msra.mxu1 %v1482_v0  ;;  %1542 = vmatpush.msra.mxu2 %v1496_v3 }
 0x8cf   :  { %1518 = vmatpush.msra.mxu1 %v1481_v40  ;;  %1543 = vmatpush.msra.mxu2 %v1495_v6  ;;  %v2061_v6 = vld [vmem:[%s2945_s25] ss:$0 sm:$0xff] }
 0x8d1   :  { %1519 = vmatpush.msra.mxu1 %v1480_v5  ;;  %1544 = vmatpush.msra.mxu2 %v1494_v1 }
 0x8d3   :  { %1520 = vmatpush.msra.mxu1 %v1479_v39  ;;  %1545 = vmatpush.msra.mxu2 %v1493_v10 }
 0x8d5   :  { %1521 = vmatpush.msra.mxu1 %v1478_v9 }
 0x8d7   :  { %1522 = vmatpush.msra.mxu1 %v1477_v35 }
 0x93b   :  { %v1276_v11 = vpop.f32.mrf.mxu1 }
 0x93c   :  { %1997 = vmatmul.msk.f32.vlgmr.msrb.gmra.mxu2 %vm491_vm13, %v1276_v11  ;;  %v1476_v11 = vld [vmem:[%s2942_s13 + $0x10] sm:$0xff] }
 0x93d   :  { %1523 = vmatpush.msra.mxu1 %v1476_v11 }
 0x93f   :  { %1524 = vmatpush.msra.mxu1 %v1475_v13 }
 0x941   :  { %1525 = vmatpush.msra.mxu1 %v1474_v17 }
 0x943   :  { %v1279_v12 = vpop.f32.mrf.mxu1 }
 0x944   :  { %1998 = vmatmul.msk.f32.gmra.mxu2 %vm491_vm13, %v1279_v12  ;;  %v1492_v12 = vld [vmem:[%s2942_s13 + $0x90] sm:$0xff] }
 0x945   :  { %1546 = vmatpush.msra.mxu2 %v1492_v12 }
 0x947   :  { %1547 = vmatpush.msra.mxu2 %v1491_v16 }
 0x949   :  { %1548 = vmatpush.msra.mxu2 %v1490_v18  ;;  %v1629_v18 = vld [vmem:[%s2946_s3 + $0x78] sm:$0xff] }
 0x94a   :  { %1634 = vmatpush.msrb.mxu3 %v1629_v18 }
 0x9bf   :  { %v1308_v22 = vpop.f32.mrf.mxu2 }
 0x9c0   :  { %v1314_v23 = vadd.f32 %v1308_v22, %v2666_v37 }
 0x9c2   :  { %v1320_v24 = vadd.f32 %v2060_v21, %v1314_v23 }
 0x9c4   :  { %1999 = vmatmul.msk.f32.vlgmr.msra.gmra.mxu3 %vm143_vm0, %v1320_v24  ;;  %2001 = vmatmul.msk.f32.vlgmr.msra.gmra.mxu0 %vm143_vm0, %v1320_v24 }
 0x9c7   :  { %v1311_v25 = vpop.f32.mrf.mxu2 }
 0x9c8   :  { %v1315_v26 = vadd.f32 %v1311_v25, %v2669_v42 }
 0x9ca   :  { %v1321_v27 = vadd.f32 %v2060_v21, %v1315_v26 }
 0x9cc   :  { %2000 = vmatmul.msk.f32.gmra.mxu3 %vm143_vm0, %v1321_v27  ;;  %2002 = vmatmul.msk.f32.gmra.mxu0 %vm143_vm0, %v1321_v27 }
 0xa41   :  { %v1390_v30 = vpop.f32.mrf.mxu0 }
 0xa42   :  { %v1391_v31 = vadd.f32 %v1390_v30, %v1341_v29 }
 0xa44   :  { %v2707_v7 = vmax.f32 %v1391_v31, 0.0 }
 0xa46   :  { %v1409_v43 = vmul.f32 %v2707_v7, %v2707_v7 }
 0xa47   :  { %v1367_v8 = vpop.f32.mrf.mxu3 }
 0xa48   :  { %v1368_v14 = vadd.f32 %v1367_v8, %v1340_v32 }
 0xa49   :  { %v1393_v33 = vpop.f32.mrf.mxu0 }
 0xa4a   :  { %v2709_v36 = vmax.f32 %v1368_v14, 0.0  ;;  %v1394_v37 = vadd.f32 %v1393_v33, %v1341_v29 }
 0xa4c   :  { %v1402_v41 = vadd.f32 %v2707_v7, %v2709_v36  ;;  %v1408_v42 = vmul.f32 %v2709_v36, %v2709_v36  ;;  %v2717_v47 = vmax.f32 %v1394_v37, 0.0 }
 0xa4e   :  { %1403 = vadd.xlane.f32.xlu0 %v1402_v41  ;;  %v1412_v45 = vadd.f32 %v1409_v43, %v1408_v42  ;;  %v1411_v15 = vmul.f32 %v2717_v47, %v2717_v47  ;;  %v1400_v42 = vld [vmem:[%s2943_s17] sm:$0x3] }
 0xa4f   :  { %v1370_v46 = vpop.f32.mrf.mxu3 }
 0xa50   :  { %v1371_v48 = vadd.f32 %v1370_v46, %v1340_v32  ;;  %1413 = vadd.xlane.f32.xlu1 %v1412_v45 }
 0xa52   :  { %v2719_v50 = vmax.f32 %v1371_v48, 0.0  ;;  %v1401_v48 = vld [vmem:[%s2944_s21] sm:$0x3] }
 0xa53   :  { %v1466_v55 = vperm.slane %v1401_v48, 0  ;;  %v1467_v44 = vperm.slane %v1401_v48, 1 }
 0xa54   :  { %v1405_v51 = vadd.f32 %v2717_v47, %v2719_v50  ;;  %v1410_v34 = vmul.f32 %v2719_v50, %v2719_v50 }
 0xa56   :  { %1406 = vadd.xlane.f32.xlu2 %v1405_v51  ;;  %v1415_v52 = vadd.f32 %v1411_v15, %v1410_v34  ;;  %v1457_v15 = vperm.slane %v1400_v42, 0 }
 0xa58   :  { %1416 = vadd.xlane.f32.xlu0 %v1415_v52  ;;  %v1458_v52 = vperm.slane %v1400_v42, 1 }
 0xac1   :  { %v1404_v19 = vpop.xlane.xlu0 %1403 }
 0xac2   :  { %v1418_v20 = vmul.f32 0.00390625, %v1404_v19  ;;  %v1628_v19 = vld [vmem:[%s2946_s3 + $0x70] sm:$0xff] }
 0xac3   :  { %v1414_v21 = vpop.xlane.xlu1 %1413  ;;  %1635 = vmatpush.msrb.mxu3 %v1628_v19 }
 0xac4   :  { %v1420_v22 = vmul.f32 0.00390625, %v1414_v21  ;;  %v1422_v23 = vmul.f32 %v1418_v20, %v1418_v20  ;;  %v1448_v51 = vsub.f32 %v2709_v36, %v1418_v20  ;;  %v1449_v34 = vsub.f32 %v2707_v7, %v1418_v20  ;;  %v1627_v20 = vld [vmem:[%s2946_s3 + $0x68] sm:$0xff]  ;;  %v1626_v21 = vld [vmem:[%s2946_s3 + $0x60] sm:$0xff] }
 0xac5   :  { %1636 = vmatpush.msrb.mxu3 %v1627_v20 }
 0xac6   :  { %v1424_v24 = vsub.f32 %v1420_v22, %v1422_v23  ;;  %v1625_v22 = vld [vmem:[%s2946_s3 + $0x58] sm:$0xff]  ;;  %v1624_v23 = vld [vmem:[%s2946_s3 + $0x50] sm:$0xff] }
 0xac7   :  { %1637 = vmatpush.msrb.mxu3 %v1626_v21 }
 0xac8   :  { %v1426_v25 = vadd.f32 1e-05, %v1424_v24  ;;  %v1623_v24 = vld [vmem:[%s2946_s3 + $0x48] sm:$0xff] }
 0xac9   :  { %v1407_v26 = vpop.xlane.xlu2 %1406  ;;  %1638 = vmatpush.msrb.mxu3 %v1625_v22 }
 0xaca   :  { %2109 = vrsqrt.f32 %v1426_v25  ;;  %v1419_v27 = vmul.f32 0.00390625, %v1407_v26  ;;  %vm1434_vm15 = vweird.f32 %v1426_v25  ;;  %v1621_v26 = vld [vmem:[%s2946_s3 + $0x38] sm:$0xff] }
 0xacb   :  { %v1417_v28 = vpop.xlane.xlu0 %1416  ;;  %1639 = vmatpush.msrb.mxu3 %v1624_v23 }
 0xacc   :  { %v1421_v29 = vmul.f32 0.00390625, %v1417_v28  ;;  %v1423_v30 = vmul.f32 %v1419_v27, %v1419_v27  ;;  %v1450_v7 = vsub.f32 %v2719_v50, %v1419_v27  ;;  %v1451_v62 = vsub.f32 %v2717_v47, %v1419_v27  ;;  %v1620_v27 = vld [vmem:[%s2946_s3 + $0x30] sm:$0xff]  ;;  %v1619_v28 = vld [vmem:[%s2946_s3 + $0x28] sm:$0xff] }
 0xacd   :  { %1640 = vmatpush.msrb.mxu3 %v1623_v24 }
 0xace   :  { %v1425_v31 = vsub.f32 %v1421_v29, %v1423_v30  ;;  %v1618_v29 = vld [vmem:[%s2946_s3 + $0x20] sm:$0xff]  ;;  %v1617_v30 = vld [vmem:[%s2946_s3 + $0x18] sm:$0xff] }
 0xad0   :  { %v2110_v32 = vpop.eup %2109  ;;  %v1427_v8 = vadd.f32 1e-05, %v1425_v31  ;;  %v1616_v31 = vld [vmem:[%s2946_s3 + $0x10] sm:$0xff] }
 0xad1   :  { %v1429_v14 = vmul.f32 %v2110_v32, %v1426_v25  ;;  %vm1435_vm14 = vweird.f32 %v2110_v32  ;;  %v1622_v25 = vld [vmem:[%s2946_s3 + $0x40] sm:$0xff] }
 0xad2   :  { %2111 = vrsqrt.f32 %v1427_v8  ;;  %vm1436_vm1 = vmor %vm1434_vm15, %vm1435_vm14  ;;  %vm1444_vm3 = vweird.f32 %v1427_v8  ;;  %1641 = vmatpush.msrb.mxu3 %v1622_v25 }
 0xad3   :  { %v1430_v33 = vmul.f32 %v2110_v32, %v1429_v14 }
 0xad4   :  { %1642 = vmatpush.msrb.mxu3 %v1621_v26  ;;  %v2824_v26 = vld [vmem:[%s2949_s19] sm:$0xff] }
 0xad5   :  { %v1431_v37 = vmul.f32 0.5, %v1430_v33 }
 0xad6   :  { %1643 = vmatpush.msrb.mxu3 %v1620_v27 }
 0xad7   :  { %v1432_v41 = vsub.f32 1.5, %v1431_v37 }
 0xad8   :  { %v2112_v43 = vpop.eup %2111  ;;  %1644 = vmatpush.msrb.mxu3 %v1619_v28 }
 0xad9   :  { %v1433_v45 = vmul.f32 %v2110_v32, %v1432_v41  ;;  %v1439_v46 = vmul.f32 %v2112_v43, %v1427_v8  ;;  %vm1445_vm2 = vweird.f32 %v2112_v43  ;;  %v1614_v8 = vld [vmem:[%s2946_s3] sm:$0xff] }
 0xada   :  { %vm1446_vm4 = vmor %vm1444_vm3, %vm1445_vm2  ;;  %1645 = vmatpush.msrb.mxu3 %v1618_v29  ;;  %v144_v29 = vsel %vm143_vm0, %v2824_v26, 0.0 }
 0xadb   :  { %v1437_v53 = vsel %vm1436_vm1, %v2110_v32, %v1433_v45  ;;  %v1440_v38 = vmul.f32 %v2112_v43, %v1439_v46  ;;  %v1615_v32 = vld [vmem:[%s2946_s3 + $0x8] sm:$0xff] }
 0xadc   :  { %v1452_v54 = vmul.f32 %v1448_v51, %v1437_v53  ;;  %v1453_v56 = vmul.f32 %v1449_v34, %v1437_v53  ;;  %1646 = vmatpush.msrb.mxu3 %v1617_v30  ;;  %v2832_v30 = vld [vmem:[%s2950_s24] sm:$0xff] }
 0xadd   :  { %v1441_v57 = vmul.f32 0.5, %v1440_v38 }
 0xade   :  { %v1461_v49 = vmul.f32 %v1457_v15, %v1452_v54  ;;  %v1462_v58 = vmul.f32 %v1458_v52, %v1453_v56  ;;  %1647 = vmatpush.msrb.mxu3 %v1616_v31 }
 0xadf   :  { %v1442_v59 = vsub.f32 1.5, %v1441_v57 }
 0xae0   :  { %v1470_v60 = vadd.f32 %v1466_v55, %v1461_v49  ;;  %v1471_v61 = vadd.f32 %v1467_v44, %v1462_v58  ;;  %1648 = vmatpush.msrb.mxu3 %v1615_v32  ;;  %v158_v32 = vmul.f32 %v2832_v30, %v2832_v30 }
 0xae1   :  { %v1443_v36 = vmul.f32 %v2112_v43, %v1442_v59 }
 0xae2   :  { %1526 = vmatmul.f32.vlgmr.msra.gmra.mxu1 %v1470_v60  ;;  %1549 = vmatmul.f32.vlgmr.msra.gmra.mxu2 %v1471_v61  ;;  %v2062_v60 = vld [vmem:[%s2947_s8] ss:$0 sm:$0xff] }
 0xae3   :  { %v1447_v63 = vsel %vm1446_vm4, %v2112_v43, %v1443_v36  ;;  %1649 = vmatpush.msrb.mxu3 %v1614_v8  ;;  %v156_v8 = vmul.f32 %v2824_v26, %v2824_v26 }
 0xae4   :  { %v1454_v0 = vmul.f32 %v1450_v7, %v1447_v63  ;;  %v1455_v2 = vmul.f32 %v1451_v62, %v1447_v63  ;;  %v2063_v62 = vld [vmem:[%s2948_s14] ss:$0 sm:$0xff] }
 0xae6   :  { %v1463_v40 = vmul.f32 %v1457_v15, %v1454_v0  ;;  %v1464_v4 = vmul.f32 %v1458_v52, %v1455_v2 }
 0xae8   :  { %v1472_v5 = vadd.f32 %v1466_v55, %v1463_v40  ;;  %v1473_v3 = vadd.f32 %v1467_v44, %v1464_v4 }
 0xaea   :  { %1529 = vmatmul.f32.gmra.mxu1 %v1472_v5  ;;  %1552 = vmatmul.f32.gmra.mxu2 %v1473_v3 }
 0xb5f   :  { %v1527_v39 = vpop.f32.mrf.mxu1 }
 0xb60   :  { %v1528_v9 = vadd.f32 %v2061_v6, %v1527_v39 }
 0xb65   :  { %v1550_v1 = vpop.f32.mrf.mxu2 }
 0xb66   :  { %v1551_v50 = vadd.f32 %v1550_v1, %v1528_v9  ;;  %v2797_v1 = vld [vmem:[%s2949_s19 + $0x8] sm:$0xff] }
 0xb67   :  { %v1530_v35 = vpop.f32.mrf.mxu1  ;;  %v157_v25 = vmul.f32 %v2797_v1, %v2797_v1 }
 0xb68   :  { %v2766_v47 = vmax.f32 %v1551_v50, 0.0  ;;  %v1531_v11 = vadd.f32 %v2061_v6, %v1530_v35  ;;  %v147_v50 = vsel %vm143_vm0, %v2797_v1, 0.0 }
 0xb69   :  { %v163_v28 = vsel %vm143_vm0, %v157_v25, 0.0 }
 0xb6a   :  { %1560 = vadd.xlane.f32.xlu1 %v2766_v47  ;;  %v1564_v10 = vmul.f32 %v2766_v47, %v2766_v47 }
 0xb6c   :  { %1566 = vadd.xlane.f32.xlu2 %v1564_v10  ;;  %v2064_v10 = vld [vmem:[%s2951_s30] ss:$0 sm:$0xff] }
 0xb6d   :  { %v1553_v12 = vpop.f32.mrf.mxu2 }
 0xb6e   :  { %v1554_v13 = vadd.f32 %v1553_v12, %v1531_v11 }
 0xb70   :  { %v2771_v16 = vmax.f32 %v1554_v13, 0.0 }
 0xb72   :  { %1562 = vadd.xlane.f32.xlu0 %v2771_v16  ;;  %v1565_v17 = vmul.f32 %v2771_v16, %v2771_v16 }
 0xb74   :  { %1568 = vadd.xlane.f32.xlu1 %v1565_v17  ;;  %148 = vadd.xlane.f32.xlu2 %v147_v50 }
 0xbdd   :  { %v1561_v14 = vpop.xlane.xlu1 %1560 }
 0xbde   :  { %v1570_v33 = vmul.f32 0.0078125, %v1561_v14  ;;  %v150_v14 = vsel %vm143_vm0, %v2832_v30, 0.0 }
 0xbdf   :  { %v1567_v37 = vpop.xlane.xlu2 %1566 }
 0xbe0   :  { %v1574_v41 = vmul.f32 %v1570_v33, %v1570_v33  ;;  %v1572_v42 = vmul.f32 0.0078125, %v1567_v37  ;;  %v1600_v59 = vsub.f32 %v2766_v47, %v1570_v33  ;;  %v2802_v47 = vld [vmem:[%s2950_s24 + $0x8] sm:$0xff]  ;;  %v166_v33 = vsel %vm143_vm0, %v158_v32, 0.0 }
 0xbe1   :  { %v153_v35 = vsel %vm143_vm0, %v2802_v47, 0.0  ;;  %v159_v27 = vmul.f32 %v2802_v47, %v2802_v47  ;;  %v160_v37 = vsel %vm143_vm0, %v156_v8, 0.0 }
 0xbe2   :  { %v1576_v43 = vsub.f32 %v1572_v42, %v1574_v41  ;;  %154 = vadd.xlane.f32.xlu0 %v153_v35 }
 0xbe3   :  { %v169_v31 = vsel %vm143_vm0, %v159_v27, 0.0 }
 0xbe4   :  { %v1578_v45 = vadd.f32 1e-05, %v1576_v43 }
 0xbe5   :  { %v1563_v46 = vpop.xlane.xlu0 %1562 }
 0xbe6   :  { %2113 = vrsqrt.f32 %v1578_v45  ;;  %v1571_v48 = vmul.f32 0.0078125, %v1563_v46  ;;  %vm1586_vm6 = vweird.f32 %v1578_v45 }
 0xbe7   :  { %v1569_v51 = vpop.xlane.xlu1 %1568  ;;  %v149_v41 = vpop.xlane.xlu2 %148 }
 0xbe8   :  { %v1575_v34 = vmul.f32 %v1571_v48, %v1571_v48  ;;  %v1573_v15 = vmul.f32 0.0078125, %v1569_v51  ;;  %v1601_v5 = vsub.f32 %v2771_v16, %v1571_v48 }
 0xbea   :  { %v1577_v52 = vsub.f32 %v1573_v15, %v1575_v34 }
 0xbec   :  { %v2114_v53 = vpop.eup %2113  ;;  %v1579_v38 = vadd.f32 1e-05, %v1577_v52 }
 0xbed   :  { %v1581_v54 = vmul.f32 %v2114_v53, %v1578_v45  ;;  %vm1587_vm5 = vweird.f32 %v2114_v53 }
 0xbee   :  { %2115 = vrsqrt.f32 %v1579_v38  ;;  %vm1588_vm7 = vmor %vm1586_vm6, %vm1587_vm5  ;;  %vm1596_vm9 = vweird.f32 %v1579_v38 }
 0xbef   :  { %v1582_v55 = vmul.f32 %v2114_v53, %v1581_v54 }
 0xbf1   :  { %v1583_v56 = vmul.f32 0.5, %v1582_v55  ;;  %v2851_v55 = vmul.f32 0.015625, %v149_v41 }
 0xbf3   :  { %v1584_v44 = vsub.f32 1.5, %v1583_v56 }
 0xbf4   :  { %v2116_v57 = vpop.eup %2115 }
 0xbf5   :  { %v1585_v49 = vmul.f32 %v2114_v53, %v1584_v44  ;;  %v1591_v58 = vmul.f32 %v2116_v57, %v1579_v38  ;;  %vm1597_vm8 = vweird.f32 %v2116_v57 }
 0xbf6   :  { %vm1598_vm10 = vmor %vm1596_vm9, %vm1597_vm8 }
 0xbf7   :  { %v1589_v61 = vsel %vm1588_vm7, %v2114_v53, %v1585_v49  ;;  %v1592_v36 = vmul.f32 %v2116_v57, %v1591_v58 }
 0xbf8   :  { %v1602_v7 = vmul.f32 %v1600_v59, %v1589_v61 }
 0xbf9   :  { %v1593_v63 = vmul.f32 0.5, %v1592_v36 }
 0xbfa   :  { %v1607_v0 = vmul.f32 %v2062_v60, %v1602_v7 }
 0xbfb   :  { %v1594_v2 = vsub.f32 1.5, %v1593_v63 }
 0xbfc   :  { %v1612_v40 = vadd.f32 %v2063_v62, %v1607_v0 }
 0xbfd   :  { %v1595_v4 = vmul.f32 %v2116_v57, %v1594_v2 }
 0xbfe   :  { %1650 = vmatmul.f32.vlgmr.msrb.gmra.mxu3 %v1612_v40 }
 0xbff   :  { %v1599_v3 = vsel %vm1598_vm10, %v2116_v57, %v1595_v4 }
 0xc00   :  { %v1603_v39 = vmul.f32 %v1601_v5, %v1599_v3 }
 0xc02   :  { %v1608_v6 = vmul.f32 %v2062_v60, %v1603_v39  ;;  %v181_v60 = vmul.f32 %v2851_v55, %v2851_v55 }
 0xc04   :  { %v1613_v9 = vadd.f32 %v2063_v62, %v1608_v6 }
 0xc06   :  { %1653 = vmatmul.f32.gmra.mxu3 %v1613_v9 }
 0xc55   :  { %v155_v43 = vpop.xlane.xlu0 %154 }
 0xc56   :  { %v2853_v57 = vmul.f32 0.015625, %v155_v43 }
 0xc58   :  { %v183_v7 = vmul.f32 %v2853_v57, %v2853_v57 }
 0xc81   :  { %v1651_v11 = vpop.f32.mrf.mxu3 }
 0xc82   :  { %v1652_v12 = vadd.f32 %v2064_v10, %v1651_v11 }
 0xc84   :  { %v2807_v13 = vmax.f32 %v1652_v12, 0.0 }
 0xc86   :  { %v1661_v16 = vsel %vm143_vm0, %v2807_v13, 0.0  ;;  %v1667_v19 = vmul.f32 %v2807_v13, %v2807_v13 }
 0xc87   :  { %1662 = vadd.xlane.f32.xlu1 %v1661_v16 }
 0xc88   :  { %v1669_v21 = vsel %vm143_vm0, %v1667_v19, 0.0 }
 0xc89   :  { %v1654_v17 = vpop.f32.mrf.mxu3 }
 0xc8a   :  { %v1655_v18 = vadd.f32 %v2064_v10, %v1654_v17 }
 0xc8c   :  { %v2813_v20 = vmax.f32 %v1655_v18, 0.0 }
 0xc8e   :  { %v1664_v22 = vsel %vm143_vm0, %v2813_v20, 0.0  ;;  %v1668_v23 = vmul.f32 %v2813_v20, %v2813_v20 }
 0xc8f   :  { %1670 = vadd.xlane.f32.xlu1 %v1669_v21  ;;  %1665 = vadd.xlane.f32.xlu2 %v1664_v22 }
 0xc90   :  { %v1672_v24 = vsel %vm143_vm0, %v1668_v23, 0.0 }
 0xc91   :  { %1673 = vadd.xlane.f32.xlu0 %v1672_v24 }
 0xc97   :  { %164 = vadd.xlane.f32.xlu2 %v163_v28  ;;  %145 = vadd.xlane.f32.xlu1 %v144_v29 }
 0xc99   :  { %170 = vadd.xlane.f32.xlu0 %v169_v31 }
 0xc9f   :  { %151 = vadd.xlane.f32.xlu2 %v150_v14  ;;  %167 = vadd.xlane.f32.xlu1 %v166_v33 }
 0xca1   :  { %161 = vadd.xlane.f32.xlu0 %v160_v37 }
 0xcfa   :  { %v1663_v42 = vpop.xlane.xlu1 %1662 }
 0xcfb   :  { %v2843_v45 = vmul.f32 0.015625, %v1663_v42 }
 0xcfd   :  { %v1679_v51 = vmul.f32 %v2843_v45, %v2843_v45 }
 0xd02   :  { %v1671_v46 = vpop.xlane.xlu1 %1670  ;;  %v1666_v48 = vpop.xlane.xlu2 %1665 }
 0xd03   :  { %v1677_v34 = vmul.f32 0.015625, %v1671_v46  ;;  %v2847_v15 = vmul.f32 0.015625, %v1666_v48  ;;  %v2191_v46 = vmov 0   ;;  %v1779_v48 = vld [vmem:[#allocation2] sm:$0x1] }
 0xd04   :  { %v1674_v52 = vpop.xlane.xlu0 %1673  ;;  %2044 = vset.pattern.permute.xlu2 %v2191_v46  ;;  %2045 = vset.pattern.permute.xlu0 %v2191_v46 }
 0xd05   :  { %v1681_v53 = vsub.f32 %v1677_v34, %v1679_v51  ;;  %v1680_v38 = vmul.f32 %v2847_v15, %v2847_v15  ;;  %v1678_v54 = vmul.f32 0.015625, %v1674_v52  ;;  %v1705_v51 = vsub.f32 %v2807_v13, %v2843_v45  ;;  %1782 = vperm.xlu2 %2044, %v1779_v48  }
 0xd06   :  { %v1706_v34 = vsub.f32 %v2813_v20, %v2847_v15  ;;  %v2067_v15 = vld [vmem:[%s2955_s12] ss:$0 sm:$0xff] }
 0xd07   :  { %v1683_v56 = vadd.f32 1e-05, %v1681_v53  ;;  %v1682_v44 = vsub.f32 %v1678_v54, %v1680_v38  ;;  %v2065_v54 = vld [vmem:[%s2954_s6] ss:$0 sm:$0xff] }
 0xd09   :  { %2117 = vrsqrt.f32 %v1683_v56  ;;  %v1684_v49 = vadd.f32 1e-05, %v1682_v44  ;;  %vm1691_vm12 = vweird.f32 %v1683_v56 }
 0xd0a   :  { %v165_v58 = vpop.xlane.xlu2 %164  ;;  %v146_v59 = vpop.xlane.xlu1 %145 }
 0xd0b   :  { %2119 = vrsqrt.f32 %v1684_v49  ;;  %v177_v61 = vmul.f32 0.015625, %v165_v58  ;;  %v2864_v39 = vmul.f32 0.015625, %v146_v59  ;;  %vm1701_vm15 = vweird.f32 %v1684_v49 }
 0xd0c   :  { %v171_v36 = vpop.xlane.xlu0 %170 }
 0xd0d   :  { %v185_v62 = vsub.f32 %v177_v61, %v181_v60  ;;  %v179_v63 = vmul.f32 0.015625, %v171_v36  ;;  %v180_v18 = vmul.f32 %v2864_v39, %v2864_v39  ;;  %v233_v60 = vsub.f32 %v2797_v1, %v2851_v55  ;;  %v2066_v61 = vld [vmem:[%s2956_s20] ss:$0 sm:$0xff] }
 0xd0f   :  { %v2118_v0 = vpop.eup %2117  ;;  %v2859_v2 = vadd.f32 1e-05, %v185_v62  ;;  %v187_v40 = vsub.f32 %v179_v63, %v183_v7 }
 0xd10   :  { %v1686_v4 = vmul.f32 %v2118_v0, %v1683_v56  ;;  %vm1692_vm11 = vweird.f32 %v2118_v0 }
 0xd11   :  { %v2120_v5 = vpop.eup %2119  ;;  %2121 = vrsqrt.f32 %v2859_v2  ;;  %v2862_v3 = vadd.f32 1e-05, %v187_v40  ;;  %vm2874_vm14 = vmor %vm1691_vm12, %vm1692_vm11  ;;  %vm208_vm3 = vweird.f32 %v2859_v2 }
 0xd12   :  { %v1687_v6 = vmul.f32 %v2118_v0, %v1686_v4  ;;  %v1696_v9 = vmul.f32 %v2120_v5, %v1684_v49  ;;  %v152_v50 = vpop.xlane.xlu2 %151  ;;  %v168_v35 = vpop.xlane.xlu1 %167  ;;  %vm1702_vm13 = vweird.f32 %v2120_v5 }
 0xd13   :  { %2123 = vrsqrt.f32 %v2862_v3  ;;  %v2867_v10 = vmul.f32 0.015625, %v152_v50  ;;  %v178_v11 = vmul.f32 0.015625, %v168_v35  ;;  %vm1703_vm1 = vmor %vm1701_vm15, %vm1702_vm13  ;;  %vm228_vm6 = vweird.f32 %v2862_v3 }
 0xd14   :  { %v1688_v12 = vmul.f32 0.5, %v1687_v6  ;;  %v1697_v16 = vmul.f32 %v2120_v5, %v1696_v9  ;;  %v162_v17 = vpop.xlane.xlu0 %161 }
 0xd15   :  { %v182_v19 = vmul.f32 %v2867_v10, %v2867_v10  ;;  %v176_v21 = vmul.f32 0.015625, %v162_v17 }
 0xd16   :  { %v1689_v22 = vsub.f32 1.5, %v1688_v12  ;;  %v1698_v23 = vmul.f32 0.5, %v1697_v16 }
 0xd17   :  { %v2122_v24 = vpop.eup %2121  ;;  %v184_v25 = vsub.f32 %v176_v21, %v180_v18  ;;  %v186_v27 = vsub.f32 %v178_v11, %v182_v19  ;;  %v2068_v11 = vld [vmem:[%s2957_s27] ss:$0 sm:$0xff] }
 0xd18   :  { %v1690_v28 = vmul.f32 %v2118_v0, %v1689_v22  ;;  %v1699_v29 = vsub.f32 1.5, %v1698_v23  ;;  %v203_v31 = vmul.f32 %v2122_v24, %v2859_v2  ;;  %vm209_vm2 = vweird.f32 %v2122_v24 }
 0xd19   :  { %v2124_v32 = vpop.eup %2123  ;;  %v2878_v14 = vadd.f32 1e-05, %v184_v25  ;;  %v2880_v33 = vadd.f32 1e-05, %v186_v27  ;;  %vm210_vm5 = vmor %vm208_vm3, %vm209_vm2  ;;  %v235_v2 = vsub.f32 %v2802_v47, %v2853_v57  ;;  %v1720_v47 = vld [vmem:[%s2351_s29] sm:$0x1]  ;;  %v232_v22 = vsub.f32 %v2824_v26, %v2864_v39 }
 0xd1a   :  { %v1694_v37 = vsel %vm2874_vm14, %v2118_v0, %v1690_v28  ;;  %v1700_v41 = vmul.f32 %v2120_v5, %v1699_v29  ;;  %v204_v42 = vmul.f32 %v2122_v24, %v203_v31  ;;  %v223_v43 = vmul.f32 %v2124_v32, %v2862_v3 }
 0xd1b   :  { %2125 = vrsqrt.f32 %v2878_v14  ;;  %v1707_v44 = vmul.f32 %v1705_v51, %v1694_v37  ;;  %vm229_vm4 = vweird.f32 %v2124_v32  ;;  %vm198_vm10 = vweird.f32 %v2878_v14  ;;  %v1719_v37 = vld [vmem:[%s2346_s5] sm:$0x1]  ;;  %s2192_s5 = smov [#allocation3]  }
 0xd1c   :  { %v1704_v52 = vsel %vm1703_vm1, %v2120_v5, %v1700_v41  ;;  %v205_v53 = vmul.f32 0.5, %v204_v42  ;;  %v224_v38 = vmul.f32 %v2124_v32, %v223_v43  ;;  %2127 = vrsqrt.f32 %v2880_v33  ;;  %vm230_vm7 = vmor %vm228_vm6, %vm229_vm4  ;;  %s1813_s29 = sshll.u32 %s2192_s5, 4  ;;  %s1814_s29 = int_to_ptr.vmem [resolvable:$true] %s1813_s29 }
 0xd1d   :  { %v1708_v56 = vmul.f32 %v1706_v34, %v1704_v52  ;;  %v1712_v7 = vmul.f32 %v2065_v54, %v1707_v44  ;;  %vm218_vm12 = vweird.f32 %v2880_v33  ;;  %v234_v25 = vsub.f32 %v2832_v30, %v2867_v10 }
 0xd1e   :  { %v206_v13 = vsub.f32 1.5, %v205_v53  ;;  %v225_v45 = vmul.f32 0.5, %v224_v38  ;;  %vm1806_vm1 = vcmask 122880  }
 0xd1f   :  { %v1713_v20 = vmul.f32 %v2065_v54, %v1708_v56  ;;  %v1717_v35 = vadd.f32 %v2067_v15, %v1712_v7 }
 0xd20   :  { %v207_v49 = vmul.f32 %v2122_v24, %v206_v13  ;;  %v226_v58 = vsub.f32 1.5, %v225_v45 }
 0xd21   :  { %v2126_v59 = vpop.eup %2125  ;;  %v1718_v36 = vadd.f32 %v2067_v15, %v1713_v20 }
 0xd22   :  { %v2128_v62 = vpop.eup %2127  ;;  %v211_v63 = vsel %vm210_vm5, %v2122_v24, %v207_v49  ;;  %v227_v0 = vmul.f32 %v2124_v32, %v226_v58  ;;  %v193_v40 = vmul.f32 %v2126_v59, %v2878_v14  ;;  %vm199_vm8 = vweird.f32 %v2126_v59 }
 0xd23   :  { %v237_v4 = vmul.f32 %v233_v60, %v211_v63  ;;  %v213_v1 = vmul.f32 %v2128_v62, %v2880_v33  ;;  %2003 = vmatpush.xpose.msk.msrb.mxu0 %vm143_vm0, %v1718_v36  ;;  %vm219_vm9 = vweird.f32 %v2128_v62  ;;  %vm200_vm11 = vmor %vm198_vm10, %vm199_vm8 }
 0xd24   :  { %v231_v55 = vsel %vm230_vm7, %v2124_v32, %v227_v0  ;;  %v194_v5 = vmul.f32 %v2126_v59, %v193_v40  ;;  %vm220_vm13 = vmor %vm218_vm12, %vm219_vm9 }
 0xd25   :  { %v244_v6 = vmul.f32 %v2066_v61, %v237_v4  ;;  %v239_v9 = vmul.f32 %v235_v2, %v231_v55  ;;  %v214_v50 = vmul.f32 %v2128_v62, %v213_v1 }
 0xd26   :  { %v195_v3 = vmul.f32 0.5, %v194_v5 }
 0xd27   :  { %v246_v12 = vmul.f32 %v2066_v61, %v239_v9  ;;  %v215_v16 = vmul.f32 0.5, %v214_v50  ;;  %2004 = vmatpush.xpose.msk.msrb.mxu0 %vm143_vm0, %v1717_v35  ;;  %v251_v18 = vadd.f32 %v2068_v11, %v244_v6 }
 0xd28   :  { %v196_v57 = vsub.f32 1.5, %v195_v3 }
 0xd29   :  { %v216_v17 = vsub.f32 1.5, %v215_v16  ;;  %v253_v19 = vadd.f32 %v2068_v11, %v246_v12 }
 0xd2a   :  { %v197_v21 = vmul.f32 %v2126_v59, %v196_v57  ;;  %2005 = vmatmul.msk.f32.vlgmr.msrb.gmra.mxu0 %vm143_vm0, %v1720_v47 }
 0xd2b   :  { %v217_v23 = vmul.f32 %v2128_v62, %v216_v17  ;;  %v255_v24 = vmul.f32 %v253_v19, %v251_v18 }
 0xd2c   :  { %v201_v27 = vsel %vm200_vm11, %v2126_v59, %v197_v21 }
 0xd2d   :  { %v236_v28 = vmul.f32 %v232_v22, %v201_v27  ;;  %v221_v29 = vsel %vm220_vm13, %v2128_v62, %v217_v23  ;;  %2006 = vmatpush.xpose.msk.msra.mxu0 %vm143_vm0, %v255_v24 }
 0xd2e   :  { %v238_v31 = vmul.f32 %v234_v25, %v221_v29 }
 0xd2f   :  { %v243_v32 = vmul.f32 %v2066_v61, %v236_v28 }
 0xd30   :  { %v245_v8 = vmul.f32 %v2066_v61, %v238_v31 }
 0xd31   :  { %v250_v14 = vadd.f32 %v2068_v11, %v243_v32 }
 0xd32   :  { %v252_v26 = vadd.f32 %v2068_v11, %v245_v8 }
 0xd34   :  { %v254_v39 = vmul.f32 %v252_v26, %v250_v14 }
 0xd36   :  { %2007 = vmatpush.xpose.msk.msra.mxu0 %vm143_vm0, %v254_v39 }
 0xd39   :  { %2008 = vmatmul.msk.f32.vlgmr.msra.gmra.mxu0 %vm143_vm0, %v1719_v37 }
 0xd5f   :  { %v1783_v41 = vpop.permute.xlu2 %1782 }
 0xd60   :  { %v1785_v30 = vperm.slane %v1783_v41, 0 }
 0xda7   :  { %v1747_v33 = vpop.f32.mrf.mxu0 }
 0xdb6   :  { %v1776_v10 = vpop.f32.mrf.mxu0 }
 0xdb7   :  { %v1777_v42 = vadd.f32 %v1776_v10, %v1747_v33 }
 0xdb9   :  { %v1786_v43 = vadd.f32 %v1785_v30, %v1777_v42 }
 0xdbb   :  { %v2009_v46 = vmul.f32 -1.442695, %v1786_v43 }
 0xdbd   :  { %2129 = vpow2.f32 %v2009_v46 }
 0xdc3   :  { %v2130_v48 = vpop.eup %2129 }
 0xdc4   :  { %v1790_v51 = vadd.f32 1.0, %v2130_v48 }
 0xdc6   :  { %2131 = vrcp.f32 %v1790_v51  ;;  %v1802_v38 = vand.u32 2147483648, %v1790_v51  ;;  %v1800_v56 = vand.u32 2147483647, %v1790_v51  ;;  %vm1796_vm0 = vweird.f32 %v1790_v51 }
 0xdc8   :  { %v1803_v13 = vor.u32 1.1754944e-38, %v1802_v38  ;;  %vm1801_vm2 = vcmp.eq.f32.partialorder %v1800_v56, 8.507059e+37 }
 0xdcc   :  { %v2132_v34 = vpop.eup %2131 }
 0xdcd   :  { %v1792_v52 = vmul.f32 %v2132_v34, %v1790_v51  ;;  %vm1797_vm14 = vweird.f32 %v2132_v34 }
 0xdce   :  { %vm1798_vm15 = vmor %vm1796_vm0, %vm1797_vm14 }
 0xdcf   :  { %v1793_v53 = vsub.f32 1.0, %v1792_v52 }
 0xdd1   :  { %v1794_v54 = vmul.f32 %v2132_v34, %v1793_v53 }
 0xdd3   :  { %v1795_v44 = vadd.f32 %v2132_v34, %v1794_v54 }
 0xdd5   :  { %v1799_v45 = vsel %vm1798_vm15, %v2132_v34, %v1795_v44 }
 0xdd6   :  { %v1804_v20 = vsel %vm1801_vm2, %v1803_v13, %v1799_v45 }
 0xdd7   :  { %1807 = vst.msk [vmem:[#allocation3] sm:$0x1] %vm1806_vm1, %v1804_v20 }
 0xdd8   :  { %2156 = shalt.err (!%p2153_p4)
}
 0xdd9   :  { %1818 = dma.vmem_to_hbm [thread:$0]  %s1814_s29, 16, %s1816_s4, [#allocation4]  }
 0xdda   :  { %2157 = dma.done.wait [#allocation4], 16  }
 0xddb   :  { %2158 = vsyncadd [#allocation4], 4294967280 }
 0xddc   :  { %1823 = vsyncpa [#allocation4], 1 }

</bundles_post_ra>
